<compile_context>
chip_gen: v5e
topology: v5e:2x2
jax: 0.10.0
libtpu: 0.0.40
codegen_flags: <defaults>
</compile_context>

<pallas_src>
import functools
from typing import NamedTuple

import jax
import jax.numpy as jnp
from jax.experimental import pallas as pl
from jax.experimental.pallas import tpu as pltpu


def _round_up(x, m):
    return ((x + m - 1) // m) * m


def _fused_mlp_kernel(x_ref, w1_ref, b1_ref, w2_ref, b2_ref, w3_ref, b3_ref,
                      w4_ref, b4_ref, o_ref, act_a, act_b, *, tn, nj):
    """Fused [Linear+ReLU] x 4 over a 2*nj-step sequential grid.

    step t == 0          : layer 1 (W1 resident), all nj column tiles
    step t in [0, nj)    : layer 2 column tile t        (streams W2 tile t)
    step t in [nj, 2*nj) : layer 3 column tile t - nj   (streams W3 tile t-nj)
    step t == 2*nj - 1   : layer 4 (W4 resident), after layer-3's last tile
    """
    t = pl.program_id(0)

    def layer(act, w_ref, b_row):
        # act: (nj, M, tn) VMEM scratch; w_ref: (nj*tn, n_out) weight block.
        # Statically unrolled K reduction, f32 accumulation on the MXU.
        acc = jnp.dot(act[0], w_ref[0:tn, :],
                      preferred_element_type=jnp.float32)
        for k in range(1, nj):
            acc += jnp.dot(act[k], w_ref[k * tn:(k + 1) * tn, :],
                           preferred_element_type=jnp.float32)
        return jnp.maximum(acc + b_row, 0.0)

    # ---- layer 1: whole layer at step 0, one column tile per unrolled iter.
    @pl.when(t == 0)
    def _():
        x = x_ref[...]                              # (M, d0) bf16
        for j in range(nj):
            y = jnp.dot(x, w1_ref[:, j * tn:(j + 1) * tn],
                        preferred_element_type=jnp.float32)
            y = jnp.maximum(y + b1_ref[:, j * tn:(j + 1) * tn], 0.0)
            act_a[j] = y.astype(act_a.dtype)

    # ---- layer 2: column tile t (reads act_a written above / at step 0).
    @pl.when(t < nj)
    def _():
        act_b[t] = layer(act_a, w2_ref, b2_ref[...]).astype(act_b.dtype)

    # ---- layer 3: column tile t - nj (act_a is free to be overwritten).
    @pl.when(t >= nj)
    def _():
        act_a[t - nj] = layer(act_b, w3_ref, b3_ref[...]).astype(act_a.dtype)

    # ---- layer 4: folded into the final layer-3 step (act_a now complete).
    @pl.when(t == 2 * nj - 1)
    def _():
        o_ref[...] = layer(act_a, w4_ref, b4_ref[...]).astype(o_ref.dtype)


class _Config(NamedTuple):
    in_feat: int
    out_feat: int
    d0: int
    hp: int
    d4: int
    tn: int
    nj: int


def init_toy_model_params(key, in_feat=10, hidden_feat=5000, out_feat=5,
                          dtype=jnp.float32):
    """f32 params mimicking nn.Linear init; weights stored as (in, out)."""
    dims = [(in_feat, hidden_feat), (hidden_feat, hidden_feat),
            (hidden_feat, hidden_feat), (hidden_feat, out_feat)]
    params = []
    for fan_in, fan_out in dims:
        key, kw, kb = jax.random.split(key, 3)
        bound = 1.0 / (fan_in ** 0.5)
        w = jax.random.uniform(kw, (fan_in, fan_out), dtype, -bound, bound)
        b = jax.random.uniform(kb, (fan_out,), dtype, -bound, bound)
        params.append((w, b))
    return params


def pack_toy_model_params(params, *, tn=1024, weight_dtype=jnp.bfloat16):
    """Zero-pad to TPU-friendly dims, cast to bf16, repack W2/W3 tile-major."""
    (w1, b1), (w2, b2), (w3, b3), (w4, b4) = params
    in_feat, hidden = w1.shape
    out_feat = w4.shape[1]

    tn = max(128, _round_up(tn, 128))
    tn = min(tn, _round_up(hidden, 128))
    d0 = _round_up(in_feat, 128)
    hp = _round_up(hidden, tn)
    d4 = _round_up(out_feat, 128)
    nj = hp // tn

    def pad_w(w, r, c):
        out = jnp.zeros((r, c), weight_dtype)
        return out.at[: w.shape[0], : w.shape[1]].set(w.astype(weight_dtype))

    def pad_b(b, c):
        out = jnp.zeros((1, c), jnp.float32)
        return out.at[0, : b.shape[0]].set(b.astype(jnp.float32))

    def tile_major_w(w):
        # (hp, hp) row-major -> (nj, hp, tn): tile j = cols [j*tn, (j+1)*tn).
        wp = pad_w(w, hp, hp)
        return jnp.transpose(wp.reshape(hp, nj, tn), (1, 0, 2))

    def tile_major_b(b):
        return pad_b(b, hp).reshape(nj, 1, tn)

    arrays = (
        pad_w(w1, d0, hp), pad_b(b1, hp),
        tile_major_w(w2), tile_major_b(b2),
        tile_major_w(w3), tile_major_b(b3),
        pad_w(w4, hp, d4), pad_b(b4, d4),
    )
    config = _Config(in_feat=in_feat, out_feat=out_feat,
                     d0=d0, hp=hp, d4=d4, tn=tn, nj=nj)
    return arrays, config


@functools.partial(jax.jit, static_argnames=("config",))
def toy_model_forward(x, arrays, config):
    w1, b1, w2, b2, w3, b3, w4, b4 = arrays
    m = x.shape[0]
    d0, hp, d4, tn, nj = config.d0, config.hp, config.d4, config.tn, config.nj

    # Pad + cast the (tiny) input once in the wrapper; kernel does no casts.
    xp = jnp.zeros((m, d0), jnp.bfloat16).at[:, : config.in_feat].set(
        x.astype(jnp.bfloat16))

    kernel = functools.partial(_fused_mlp_kernel, tn=tn, nj=nj)

    def const_map(t):
        return (0, 0)

    def w2_map(t):                       # active on [0, nj); clamps after
        return (jnp.minimum(t, nj - 1), 0, 0)

    def w3_map(t):                       # active on [nj, 2*nj); clamps before
        return (jnp.minimum(jnp.maximum(t - nj, 0), nj - 1), 0, 0)

    out_padded = pl.pallas_call(
        kernel,
        out_shape=jax.ShapeDtypeStruct((m, d4), jnp.float32),
        grid=(2 * nj,),
        in_specs=[
            pl.BlockSpec((m, d0), const_map),         # x      (resident)
            pl.BlockSpec((d0, hp), const_map),        # W1     (resident)
            pl.BlockSpec((1, hp), const_map),         # b1     (resident)
            pl.BlockSpec((None, hp, tn), w2_map),     # W2 tile-major stream
            pl.BlockSpec((None, 1, tn), w2_map),      # b2 tile-major stream
            pl.BlockSpec((None, hp, tn), w3_map),     # W3 tile-major stream
            pl.BlockSpec((None, 1, tn), w3_map),      # b3 tile-major stream
            pl.BlockSpec((hp, d4), const_map),        # W4     (resident)
            pl.BlockSpec((1, d4), const_map),         # b4     (resident)
        ],
        out_specs=pl.BlockSpec((m, d4), const_map),
        scratch_shapes=[
            pltpu.VMEM((nj, m, tn), w1.dtype),        # activation ping
            pltpu.VMEM((nj, m, tn), w1.dtype),        # activation pong
        ],
        compiler_params=pltpu.CompilerParams(
            dimension_semantics=("arbitrary",),       # sequential fused loop
            vmem_limit_bytes=56 * 1024 * 1024,        # ~45 MiB peak at tn=1024
        ),
    )(xp, w1, b1, w2, b2, w3, b3, w4, b4)

    return out_padded[:, : config.out_feat]


def toy_model_ref(x, params, compute_dtype=jnp.float32):
    """Pure-JAX reference; compute_dtype=bf16 mimics the kernel's casts."""
    h = x.astype(jnp.float32)
    for w, b in params:
        y = jnp.dot(h.astype(compute_dtype), w.astype(compute_dtype),
                    preferred_element_type=jnp.float32) + b.astype(jnp.float32)
        h = jnp.maximum(y, 0.0)
    return h


if __name__ == "__main__":
    # Small shapes consistent with ToyModel(in_feat=10, hidden_feat=5000,
    # out_feat=5); hidden shrunk to 512 to keep the example small.
    batch, in_feat, hidden_feat, out_feat = 8, 10, 512, 5

    key = jax.random.PRNGKey(0)
    key, kx = jax.random.split(key)
    x = jax.random.normal(kx, (batch, in_feat), jnp.float32)
    params = init_toy_model_params(key, in_feat, hidden_feat, out_feat)

    arrays, config = pack_toy_model_params(params, tn=1024,
                                           weight_dtype=jnp.bfloat16)

    out = toy_model_forward(x, arrays, config)
    out = jax.block_until_ready(out)
    assert out.shape == (batch, out_feat)

    # Plumbing check vs a numerics-matched (bf16 streaming) reference.
    ref_matched = toy_model_ref(x, params, compute_dtype=jnp.bfloat16)
    assert jnp.allclose(out, ref_matched, rtol=1e-2, atol=1e-2), \
        "mismatch vs bf16-matched reference"

    # Semantic check vs the full-f32 reference (bf16 weight-streaming tol).
    ref_f32 = toy_model_ref(x, params, compute_dtype=jnp.float32)
    assert jnp.allclose(out, ref_f32, rtol=5e-2, atol=5e-2), \
        "mismatch vs f32 reference"

    print("KERNEL_OK")
</pallas_src>

<mosaic_0001>
module attributes {stable_mosaic.version = 11 : i64} {
  func.func @_fused_mlp_kernel(%arg0: i32, %arg1: memref<8x128xbf16, #tpu.memory_space<vmem>>, %arg2: memref<128x512xbf16, #tpu.memory_space<vmem>>, %arg3: memref<1x512xf32, #tpu.memory_space<vmem>>, %arg4: memref<1x512x512xbf16, #tpu.memory_space<vmem>>, %arg5: memref<1x1x512xf32, #tpu.memory_space<vmem>>, %arg6: memref<1x512x512xbf16, #tpu.memory_space<vmem>>, %arg7: memref<1x1x512xf32, #tpu.memory_space<vmem>>, %arg8: memref<512x128xbf16, #tpu.memory_space<vmem>>, %arg9: memref<1x128xf32, #tpu.memory_space<vmem>>, %arg10: memref<8x128xf32, #tpu.memory_space<vmem>>, %arg11: memref<1x8x512xbf16, #tpu.memory_space<vmem>>, %arg12: memref<1x8x512xbf16, #tpu.memory_space<vmem>>) attributes {dimension_semantics = [#tpu.dimension_semantics<arbitrary>], iteration_bounds = array<i64: 2>, scalar_prefetch = 0 : i64, scratch_operands = 2 : i64, tpu.core_type = #tpu.core_type<tc>, window_params = [{pipeline_mode = #tpu.pipeline_mode<synchronous>, transform_indices = @transform_0, window_bounds = array<i64: 8, 128>}, {pipeline_mode = #tpu.pipeline_mode<synchronous>, transform_indices = @transform_1, window_bounds = array<i64: 128, 512>}, {pipeline_mode = #tpu.pipeline_mode<synchronous>, transform_indices = @transform_2, window_bounds = array<i64: 1, 512>}, {transform_indices = @transform_3, window_bounds = array<i64: 1, 512, 512>}, {transform_indices = @transform_4, window_bounds = array<i64: 1, 1, 512>}, {transform_indices = @transform_5, window_bounds = array<i64: 1, 512, 512>}, {transform_indices = @transform_6, window_bounds = array<i64: 1, 1, 512>}, {pipeline_mode = #tpu.pipeline_mode<synchronous>, transform_indices = @transform_7, window_bounds = array<i64: 512, 128>}, {pipeline_mode = #tpu.pipeline_mode<synchronous>, transform_indices = @transform_8, window_bounds = array<i64: 1, 128>}, {pipeline_mode = #tpu.pipeline_mode<synchronous>, transform_indices = @transform_9, window_bounds = array<i64: 8, 128>}]} {
    %c0_i32 = arith.constant 0 : i32
    %0 = arith.cmpi eq, %arg0, %c0_i32 : i32
    %1 = arith.extui %0 : i1 to i32
    %c0_i32_0 = arith.constant 0 : i32
    %2 = arith.cmpi ne, %1, %c0_i32_0 : i32
    scf.if %2 {
      %c0 = arith.constant 0 : index
      %c0_6 = arith.constant 0 : index
      %12 = vector.load %arg1[%c0, %c0_6] : memref<8x128xbf16, #tpu.memory_space<vmem>>, vector<8x128xbf16>
      %c0_7 = arith.constant 0 : index
      %c0_8 = arith.constant 0 : index
      %13 = vector.load %arg2[%c0_7, %c0_8] : memref<128x512xbf16, #tpu.memory_space<vmem>>, vector<128x512xbf16>
      %cst = arith.constant dense<0.000000e+00> : vector<8x512xf32>
      %14 = tpu.matmul %12, %13, %cst {dimension_numbers = #tpu.dot_dimension_numbers<[1], [0], [0], [1], [0, 0, 1, 1], [], []>} : vector<8x128xbf16>, vector<128x512xbf16>, vector<8x512xf32> -> vector<8x512xf32>
      %c0_9 = arith.constant 0 : index
      %c0_10 = arith.constant 0 : index
      %15 = vector.load %arg3[%c0_9, %c0_10] : memref<1x512xf32, #tpu.memory_space<vmem>>, vector<1x512xf32>
      %16 = vector.broadcast %15 : vector<1x512xf32> to vector<8x512xf32>
      %17 = arith.addf %14, %16 : vector<8x512xf32>
      %cst_11 = arith.constant 0.000000e+00 : f32
      %18 = vector.broadcast %cst_11 : f32 to vector<8x512xf32>
      %19 = arith.maximumf %17, %18 : vector<8x512xf32>
      %20 = arith.truncf %19 : vector<8x512xf32> to vector<8x512xbf16>
      %c0_12 = arith.constant 0 : index
      %c0_13 = arith.constant 0 : index
      %c0_14 = arith.constant 0 : index
      %21 = vector.load %arg11[%c0_12, %c0_13, %c0_14] : memref<1x8x512xbf16, #tpu.memory_space<vmem>>, vector<1x8x512xbf16>
      %22 = vector.shape_cast %21 : vector<1x8x512xbf16> to vector<8x512xbf16>
      %23 = vector.shape_cast %20 : vector<8x512xbf16> to vector<1x8x512xbf16>
      tpu.vector_store %arg11[%c0_12, %c0_13, %c0_14], %23 {strides = array<i32>} : memref<1x8x512xbf16, #tpu.memory_space<vmem>>, vector<1x8x512xbf16>,
    } else {
    }
    %c1_i32 = arith.constant 1 : i32
    %3 = arith.cmpi slt, %arg0, %c1_i32 : i32
    %4 = arith.extui %3 : i1 to i32
    %c0_i32_1 = arith.constant 0 : i32
    %5 = arith.cmpi ne, %4, %c0_i32_1 : i32
    scf.if %5 {
      %c0 = arith.constant 0 : index
      %c0_6 = arith.constant 0 : index
      %c0_7 = arith.constant 0 : index
      %12 = vector.load %arg5[%c0, %c0_6, %c0_7] : memref<1x1x512xf32, #tpu.memory_space<vmem>>, vector<1x1x512xf32>
      %13 = vector.shape_cast %12 : vector<1x1x512xf32> to vector<1x512xf32>
      %c0_8 = arith.constant 0 : index
      %c0_9 = arith.constant 0 : index
      %c0_10 = arith.constant 0 : index
      %14 = vector.load %arg11[%c0_8, %c0_9, %c0_10] : memref<1x8x512xbf16, #tpu.memory_space<vmem>>, vector<1x8x512xbf16>
      %15 = vector.shape_cast %14 : vector<1x8x512xbf16> to vector<8x512xbf16>
      %c0_11 = arith.constant 0 : index
      %c0_12 = arith.constant 0 : index
      %c0_13 = arith.constant 0 : index
      %16 = vector.load %arg4[%c0_11, %c0_12, %c0_13] : memref<1x512x512xbf16, #tpu.memory_space<vmem>>, vector<1x512x512xbf16>
      %17 = vector.shape_cast %16 : vector<1x512x512xbf16> to vector<512x512xbf16>
      %cst = arith.constant dense<0.000000e+00> : vector<8x512xf32>
      %18 = tpu.matmul %15, %17, %cst {dimension_numbers = #tpu.dot_dimension_numbers<[1], [0], [0], [1], [0, 0, 1, 1], [], []>} : vector<8x512xbf16>, vector<512x512xbf16>, vector<8x512xf32> -> vector<8x512xf32>
      %19 = vector.broadcast %13 : vector<1x512xf32> to vector<8x512xf32>
      %20 = arith.addf %18, %19 : vector<8x512xf32>
      %cst_14 = arith.constant 0.000000e+00 : f32
      %21 = vector.broadcast %cst_14 : f32 to vector<8x512xf32>
      %22 = arith.maximumf %20, %21 : vector<8x512xf32>
      %23 = arith.truncf %22 : vector<8x512xf32> to vector<8x512xbf16>
      %24 = arith.index_cast %arg0 : i32 to index
      %c0_15 = arith.constant 0 : index
      %c0_16 = arith.constant 0 : index
      %25 = vector.load %arg12[%24, %c0_15, %c0_16] : memref<1x8x512xbf16, #tpu.memory_space<vmem>>, vector<1x8x512xbf16>
      %26 = vector.shape_cast %25 : vector<1x8x512xbf16> to vector<8x512xbf16>
      %27 = vector.shape_cast %23 : vector<8x512xbf16> to vector<1x8x512xbf16>
      tpu.vector_store %arg12[%24, %c0_15, %c0_16], %27 {strides = array<i32>} : memref<1x8x512xbf16, #tpu.memory_space<vmem>>, vector<1x8x512xbf16>,
    } else {
    }
    %c1_i32_2 = arith.constant 1 : i32
    %6 = arith.cmpi sge, %arg0, %c1_i32_2 : i32
    %7 = arith.extui %6 : i1 to i32
    %c0_i32_3 = arith.constant 0 : i32
    %8 = arith.cmpi ne, %7, %c0_i32_3 : i32
    scf.if %8 {
      %c0 = arith.constant 0 : index
      %c0_6 = arith.constant 0 : index
      %c0_7 = arith.constant 0 : index
      %12 = vector.load %arg7[%c0, %c0_6, %c0_7] : memref<1x1x512xf32, #tpu.memory_space<vmem>>, vector<1x1x512xf32>
      %13 = vector.shape_cast %12 : vector<1x1x512xf32> to vector<1x512xf32>
      %c0_8 = arith.constant 0 : index
      %c0_9 = arith.constant 0 : index
      %c0_10 = arith.constant 0 : index
      %14 = vector.load %arg12[%c0_8, %c0_9, %c0_10] : memref<1x8x512xbf16, #tpu.memory_space<vmem>>, vector<1x8x512xbf16>
      %15 = vector.shape_cast %14 : vector<1x8x512xbf16> to vector<8x512xbf16>
      %c0_11 = arith.constant 0 : index
      %c0_12 = arith.constant 0 : index
      %c0_13 = arith.constant 0 : index
      %16 = vector.load %arg6[%c0_11, %c0_12, %c0_13] : memref<1x512x512xbf16, #tpu.memory_space<vmem>>, vector<1x512x512xbf16>
      %17 = vector.shape_cast %16 : vector<1x512x512xbf16> to vector<512x512xbf16>
      %cst = arith.constant dense<0.000000e+00> : vector<8x512xf32>
      %18 = tpu.matmul %15, %17, %cst {dimension_numbers = #tpu.dot_dimension_numbers<[1], [0], [0], [1], [0, 0, 1, 1], [], []>} : vector<8x512xbf16>, vector<512x512xbf16>, vector<8x512xf32> -> vector<8x512xf32>
      %19 = vector.broadcast %13 : vector<1x512xf32> to vector<8x512xf32>
      %20 = arith.addf %18, %19 : vector<8x512xf32>
      %cst_14 = arith.constant 0.000000e+00 : f32
      %21 = vector.broadcast %cst_14 : f32 to vector<8x512xf32>
      %22 = arith.maximumf %20, %21 : vector<8x512xf32>
      %23 = arith.truncf %22 : vector<8x512xf32> to vector<8x512xbf16>
      %c1_i32_15 = arith.constant 1 : i32
      %24 = arith.subi %arg0, %c1_i32_15 : i32
      %25 = arith.index_cast %24 : i32 to index
      %c0_16 = arith.constant 0 : index
      %c0_17 = arith.constant 0 : index
      %26 = vector.load %arg11[%25, %c0_16, %c0_17] : memref<1x8x512xbf16, #tpu.memory_space<vmem>>, vector<1x8x512xbf16>
      %27 = vector.shape_cast %26 : vector<1x8x512xbf16> to vector<8x512xbf16>
      %28 = vector.shape_cast %23 : vector<8x512xbf16> to vector<1x8x512xbf16>
      tpu.vector_store %arg11[%25, %c0_16, %c0_17], %28 {strides = array<i32>} : memref<1x8x512xbf16, #tpu.memory_space<vmem>>, vector<1x8x512xbf16>,
    } else {
    }
    %c1_i32_4 = arith.constant 1 : i32
    %9 = arith.cmpi eq, %arg0, %c1_i32_4 : i32
    %10 = arith.extui %9 : i1 to i32
    %c0_i32_5 = arith.constant 0 : i32
    %11 = arith.cmpi ne, %10, %c0_i32_5 : i32
    scf.if %11 {
      %c0 = arith.constant 0 : index
      %c0_6 = arith.constant 0 : index
      %12 = vector.load %arg9[%c0, %c0_6] : memref<1x128xf32, #tpu.memory_space<vmem>>, vector<1x128xf32>
      %c0_7 = arith.constant 0 : index
      %c0_8 = arith.constant 0 : index
      %c0_9 = arith.constant 0 : index
      %13 = vector.load %arg11[%c0_7, %c0_8, %c0_9] : memref<1x8x512xbf16, #tpu.memory_space<vmem>>, vector<1x8x512xbf16>
      %14 = vector.shape_cast %13 : vector<1x8x512xbf16> to vector<8x512xbf16>
      %c0_10 = arith.constant 0 : index
      %c0_11 = arith.constant 0 : index
      %15 = vector.load %arg8[%c0_10, %c0_11] : memref<512x128xbf16, #tpu.memory_space<vmem>>, vector<512x128xbf16>
      %cst = arith.constant dense<0.000000e+00> : vector<8x128xf32>
      %16 = tpu.matmul %14, %15, %cst {dimension_numbers = #tpu.dot_dimension_numbers<[1], [0], [0], [1], [0, 0, 1, 1], [], []>} : vector<8x512xbf16>, vector<512x128xbf16>, vector<8x128xf32> -> vector<8x128xf32>
      %17 = vector.broadcast %12 : vector<1x128xf32> to vector<8x128xf32>
      %18 = arith.addf %16, %17 : vector<8x128xf32>
      %cst_12 = arith.constant 0.000000e+00 : f32
      %19 = vector.broadcast %cst_12 : f32 to vector<8x128xf32>
      %20 = arith.maximumf %18, %19 : vector<8x128xf32>
      %c0_13 = arith.constant 0 : index
      %c0_14 = arith.constant 0 : index
      %21 = vector.load %arg10[%c0_13, %c0_14] : memref<8x128xf32, #tpu.memory_space<vmem>>, vector<8x128xf32>
      tpu.vector_store %arg10[%c0_13, %c0_14], %20 {strides = array<i32>} : memref<8x128xf32, #tpu.memory_space<vmem>>, vector<8x128xf32>,
    } else {
    }
    return
  }
  func.func @transform_0(%arg0: i32) -> (i32, i32) {
    %c0_i32 = arith.constant 0 : i32
    %c0_i32_0 = arith.constant 0 : i32
    %c0_i32_1 = arith.constant 0 : i32
    return %c0_i32, %c0_i32_0 : i32, i32
  }
  func.func @transform_1(%arg0: i32) -> (i32, i32) {
    %c0_i32 = arith.constant 0 : i32
    %c0_i32_0 = arith.constant 0 : i32
    %c0_i32_1 = arith.constant 0 : i32
    return %c0_i32, %c0_i32_0 : i32, i32
  }
  func.func @transform_2(%arg0: i32) -> (i32, i32) {
    %c0_i32 = arith.constant 0 : i32
    %c0_i32_0 = arith.constant 0 : i32
    %c0_i32_1 = arith.constant 0 : i32
    return %c0_i32, %c0_i32_0 : i32, i32
  }
  func.func @transform_3(%arg0: i32) -> (i32, i32, i32) {
    %c0_i32 = arith.constant 0 : i32
    %0 = arith.minsi %arg0, %c0_i32 : i32
    %c0_i32_0 = arith.constant 0 : i32
    %c0_i32_1 = arith.constant 0 : i32
    %c0_i32_2 = arith.constant 0 : i32
    return %0, %c0_i32_0, %c0_i32_1 : i32, i32, i32
  }
  func.func @transform_4(%arg0: i32) -> (i32, i32, i32) {
    %c0_i32 = arith.constant 0 : i32
    %0 = arith.minsi %arg0, %c0_i32 : i32
    %c0_i32_0 = arith.constant 0 : i32
    %c0_i32_1 = arith.constant 0 : i32
    %c0_i32_2 = arith.constant 0 : i32
    return %0, %c0_i32_0, %c0_i32_1 : i32, i32, i32
  }
  func.func @transform_5(%arg0: i32) -> (i32, i32, i32) {
    %c1_i32 = arith.constant 1 : i32
    %0 = arith.subi %arg0, %c1_i32 : i32
    %c0_i32 = arith.constant 0 : i32
    %1 = arith.maxsi %0, %c0_i32 : i32
    %c0_i32_0 = arith.constant 0 : i32
    %2 = arith.minsi %1, %c0_i32_0 : i32
    %c0_i32_1 = arith.constant 0 : i32
    %c0_i32_2 = arith.constant 0 : i32
    %c0_i32_3 = arith.constant 0 : i32
    return %2, %c0_i32_1, %c0_i32_2 : i32, i32, i32
  }
  func.func @transform_6(%arg0: i32) -> (i32, i32, i32) {
    %c1_i32 = arith.constant 1 : i32
    %0 = arith.subi %arg0, %c1_i32 : i32
    %c0_i32 = arith.constant 0 : i32
    %1 = arith.maxsi %0, %c0_i32 : i32
    %c0_i32_0 = arith.constant 0 : i32
    %2 = arith.minsi %1, %c0_i32_0 : i32
    %c0_i32_1 = arith.constant 0 : i32
    %c0_i32_2 = arith.constant 0 : i32
    %c0_i32_3 = arith.constant 0 : i32
    return %2, %c0_i32_1, %c0_i32_2 : i32, i32, i32
  }
  func.func @transform_7(%arg0: i32) -> (i32, i32) {
    %c0_i32 = arith.constant 0 : i32
    %c0_i32_0 = arith.constant 0 : i32
    %c0_i32_1 = arith.constant 0 : i32
    return %c0_i32, %c0_i32_0 : i32, i32
  }
  func.func @transform_8(%arg0: i32) -> (i32, i32) {
    %c0_i32 = arith.constant 0 : i32
    %c0_i32_0 = arith.constant 0 : i32
    %c0_i32_1 = arith.constant 0 : i32
    return %c0_i32, %c0_i32_0 : i32, i32
  }
  func.func @transform_9(%arg0: i32) -> (i32, i32) {
    %c0_i32 = arith.constant 0 : i32
    %c0_i32_0 = arith.constant 0 : i32
    %c0_i32_1 = arith.constant 0 : i32
    return %c0_i32, %c0_i32_0 : i32, i32
  }
}

</mosaic_0001>

<bundles_post_ra>
// kernel: toy_model_forward.1
= control target key start
LH: loop header
LB: loop body
LE: loop exit
PB: predicated region body
PF: predicated region fallthrough
CT: control target
= control target key end

     0   :  { %s5795_s0 = inlined_call_operand.vmem [shape: bf16[8,128], index: 0, kind: input, shape index: {}]   ;;  %s5796_s1 = inlined_call_operand.hbm [shape: bf16[128,512], index: 1, kind: input, shape index: {}]   ;;  %s5797_s2 = inlined_call_operand.vmem [shape: f32[1,512], index: 2, kind: input, shape index: {}]   ;;  %s5798_s3 = inlined_call_operand.hbm [shape: bf16[1,512,512], index: 3, kind: input, shape index: {}]   ;;  %s5799_s4 = inlined_call_operand.vmem [shape: f32[1,1,512], index: 4, kind: input, shape index: {}]   ;;  %s5800_s5 = inlined_call_operand.hbm [shape: bf16[1,512,512], index: 5, kind: input, shape index: {}]   ;;  %s5801_s6 = inlined_call_operand.vmem [shape: f32[1,1,512], index: 6, kind: input, shape index: {}]   ;;  %s5802_s7 = inlined_call_operand.hbm [shape: bf16[512,128], index: 7, kind: input, shape index: {}]   ;;  %s5803_s8 = inlined_call_operand.vmem [shape: f32[1,128], index: 8, kind: input, shape index: {}]   ;;  %s5804_s9 = inlined_call_operand.hbm [shape: f32[8,128], index: 9, kind: output, shape index: {}]  }
   0x1   :  { %5805 = sst [smem:[#allocation18_spill]] %s5796_s1 }
   0x2   :  { %5806 = sst [smem:[#allocation19_spill]] %s5798_s3 }
   0x3   :  { %14 = vsyncpa [#allocation5], 0 }
   0x4   :  { %15 = vsyncpa [#allocation8], 0 }
   0x5   :  { %17 = vsyncpa [#allocation8 + $0x1], 0 }
   0x6   :  { %18 = vsyncpa [#allocation11], 0 }
   0x7   :  { %19 = vsyncpa [#allocation6], 0  ;;  %s5299_s30 = smov 0   ;;  %s5301_s10 = smov 0  }
   0x8   :  { %s5303_s11 = smov 0   ;;  %s5305_s12 = smov 0  }
   0x9 LB: > { %s5320_s13 = sadd.s32 1, %s5239_s12   ;;  %p92_p0 = scmp.lt.s32.totalorder %s5239_s12, 0  ;;  %s5239_s12 = sphi %s5305_s12, %s5817_s12   ;;  %s5235_s11 = sphi %s5303_s11, %s5816_s11   ;;  %s5231_s10 = sphi %s5301_s10, %s5815_s10   ;;  %s5227_s30 = sphi %s5299_s30, %s5814_s30  }
   0xa   : > { %p94_p1 = scmp.lt.s32.totalorder %s5320_s13, 0  ;;  %s99_s14 = sadd.s32 1, %s5235_s11 }
   0xb   : > { %s93_s15 = scalar_select %p92_p0, %s5239_s12, 0 }
   0xc   : > { %s95_s16 = scalar_select %p94_p1, %s5320_s13, 0 }
   0xd   : > { %p106_p2 = scmp.ne.s32.totalorder %s5235_s11, %s5231_s10  ;;  %p107_p3 = scmp.eq.s32.totalorder %s5239_s12, 0 }
   0xe   : > { %s96_s17 = ssub.s32 %s93_s15, %s95_s16  ;;  %p4995_p6 = scmp.lt.s32.totalorder %s5239_s12, 2 }
   0xf   : > { %p97_p4 = scmp.eq.s32.totalorder %s96_s17, 0  ;;  %p5332_p5 = por %p107_p3, %p106_p2 }
  0x10   : > { %s338_s20 = sand.u32 1, %s5239_s12   ;;  %s340_s21 = sand.u32 1, %s5235_s11  }
  0x11   : > { %s5337_s19 = scalar_select %p97_p4, %s5235_s11, %s99_s14  }
  0x12   : > { %s3319_s22 = sshll.u32 %s340_s21, 10  ;;  %s4640_s23 = sshll.u32 %s93_s15, 10 }
  0x13   : > { %s5808_s3 = sld [smem:[#allocation19_spill]]  ;;  %s342_s28 = scalar_lea.vmem [#allocation7], %s3319_s22 }
  0x14   : > { %s352_s29 = sshll.u32 %s342_s28, 4  ;;  %p5347_p7 = pnand %p4995_p6, %p5332_p5  ;;  %s353_s29 = int_to_ptr.vmem [resolvable:$true] %s352_s29 }
  0x15   : > { %p5353_p8 = pnand %p4995_p6, %p107_p3  ;;  %s5358_s15 = sadd.s32 4294967295, %s5239_s12  }
  0x16   : > { %s5360_s17 = scalar_lea.sflag [#allocation8], %s338_s20  ;;  %p5045_p10 = pneg %p5347_p7 }
  0x19   : > { %s349_s26 = scalar_lea.hbm %s5808_s3, %s4640_s23  ;;  %s5048_s24 = scalar_lea.hbm %s5808_s3, 1024 }
  0x1a   : > { %s350_s27 = sshll.u32 %s349_s26, 4  ;;  %s351_s27 = int_to_ptr.hbm [resolvable:$true] %s350_s27 }
  0x1b   : > { %s5041_s21 = sshra.s32 %s351_s27, 4  ;;  %s5042_s21 = int_to_ptr.hbm [resolvable:$true] %s5041_s21 }
  0x1c   : > { %s5043_s22 = scalar_lea.hbm %s5042_s21, 1024  ;;  %p5049_p13 = scmp.lt.s32.totalorder %s5042_s21, %s5808_s3 }
  0x1d   : > { %p5044_p9 = scmp.ne.s32.totalorder %s5042_s21, %s5043_s22  ;;  %p5050_p0 = scmp.lt.s32.totalorder %s5048_s24, %s5043_s22 }
  0x1f   : > { %p5046_p11 = pnand %p5045_p10, %p5044_p9  ;;  %p5051_p1 = por %p5050_p0, %p5049_p13 }
  0x21   : > { %p5047_p12 = pneg %p5046_p11 }
  0x23   : > { %p5052_p2 = pnand %p5051_p1, %p5047_p12 }
  0x25   : > { %5055 = shalt.err (!%p5052_p2)
}
  0x26   : > { %s5241_s20 = smov 256   ;;  %s5242_s28 = smov 16  }
  0x27   : > { %4989 = dma.hbm_to_vmem [thread:$0]  (!%p5347_p7), %s351_s27, 16384, %s353_s29, %s5360_s17, %s5241_s20, %s5241_s20, %s5242_s28  }
  0x28   : > { %p113_p3 = scmp.eq.s32.totalorder %s5358_s15, 0  ;;  %p112_p4 = scmp.ne.s32.totalorder %s5231_s10, %s5227_s30 }
  0x29   : > { %p3315_p5 = scmp.ge.s32.totalorder %s5239_s12, 1  ;;  %p288_p6 = scmp.lt.s32.totalorder %s5239_s12, 3 }
  0x2a   : > { %p3316_p9 = scmp.ne.s32.totalorder %s5358_s15, 0  ;;  %p5384_p10 = por %p113_p3, %p112_p4 }
  0x2b   : > { %s5812_s1 = sld [smem:[#allocation18_spill]]  ;;  %p5391_p11 = pnand %p3315_p5, %p288_p6 }
  0x2c   : > { %s319_s12 = sshll.u32 %s5802_s7, 4  ;;  %s5243_s29 = smov [#allocation4]   ;;  %s320_s12 = int_to_ptr.hbm [resolvable:$true] %s319_s12 }
  0x2d   : > { %p4979_p7 = pneg %p5391_p11  ;;  %s304_s24 = sshll.u32 %s5243_s29, 4  ;;  %s305_s24 = int_to_ptr.vmem [resolvable:$true] %s304_s24 }
  0x2e   : > { %s5244_s25 = smov [#allocation10]   ;;  %s388_s27 = sshll.u32 %s5800_s5, 4  ;;  %s389_s27 = int_to_ptr.hbm [resolvable:$true] %s388_s27 }
  0x2f   : > { %p4980_p12 = pnand %p4979_p7, %p113_p3  ;;  %s321_s26 = sshll.u32 %s5244_s25, 4  ;;  %s322_s26 = int_to_ptr.vmem [resolvable:$true] %s321_s26 }
  0x30   : > { %s5245_s30 = smov 64   ;;  %s5247_s29 = smov [#allocation9]  }
  0x31   : > { %s302_s23 = sshll.u32 %s5812_s1, 4  ;;  %s5246_s1 = smov 4   ;;  %s303_s23 = int_to_ptr.hbm [resolvable:$true] %s302_s23 }
  0x32   : > { %4982 = dma.hbm_to_vmem [thread:$0]  (!%p4980_p12), %s303_s23, 4096, %s305_s24, [#allocation5], %s5241_s20, %s5241_s20, %s5242_s28  }
  0x33   : > { %4985 = dma.hbm_to_vmem [thread:$0]  (!%p4980_p12), %s320_s12, 4096, %s322_s26, [#allocation11], %s5245_s30, %s5245_s30, %s5246_s1  }
  0x34   : > { %s390_s3 = sshll.u32 %s5247_s29, 4  ;;  %419 = sbr.rel (%p5391_p11) target bundleno = 997 (0x3e5), region = 56  ;;  %s391_s3 = int_to_ptr.vmem [resolvable:$true] %s390_s3 }
  0x35   : > { %4992 = dma.hbm_to_vmem [thread:$0]  (!%p5353_p8), %s389_s27, 16384, %s391_s3, %s5360_s17, %s5241_s20, %s5241_s20, %s5242_s28  }
  0x39   : > { %5206 = dma.done.wait (%p113_p3), [#allocation5], 4096  }
  0x3a   : > { %5208 = vsyncadd (%p113_p3), [#allocation5], 4294963200  ;;  %s426_s1 = sand.u32 1, %s5358_s15   ;;  %s428_s23 = sand.u32 1, %s5231_s10  }
  0x3b   : > { %s3333_s12 = sshll.u32 %s428_s23, 10  ;;  %s427_s14 = scalar_lea.sflag [#allocation8], %s426_s1 }
  0x3c   : > { %s5422_s24 = scalar_lea.vmem [#allocation7], %s3333_s12 }
  0x3d   : > { %5210 = dma.done.wait (%p5384_p10), %s427_s14, 16384  }
  0x3e   : > { %5212 = vsyncadd (%p5384_p10), %s427_s14, 4294950912 }
  0x3f   : > { %5214 = dma.done.wait (%p113_p3), %s427_s14, 16384  }
  0x40   : > { %5216 = vsyncadd (%p113_p3), %s427_s14, 4294950912 }
  0x41   : > { %5218 = dma.done.wait (%p113_p3), [#allocation11], 4096  }
  0x42   : > { %5220 = vsyncadd (%p113_p3), [#allocation11], 4294963200  ;;  %p498_p8 = scmp.lt.s32.totalorder %s5358_s15, 0 }
  0x44   : > { %s499_s3 = scalar_select %p498_p8, %s5358_s15, 0 }
  0x45   : > { %528 = sbr.rel (%p3316_p9) target bundleno = 250 (0xfa), region = 76 }
  0x46   : > { %s5819_s3 = smov (!%p498_p8, %s499_s3), 0 }
  0x47   : > { %s3339_s17 = sshll.u32 %s5819_s3, 2 }
  0x48   : > { %s5441_s21 = scalar_lea.vmem %s5799_s4, %s3339_s17 }
  0x4a   : > { %v3462_v0 = vld [vmem:[#allocation4 + $0xe0] sm:$0xf]  ;;  %v4671_v1 = vld [vmem:[#allocation4 + $0xec] sm:$0xf0]  ;;  %v4669_v2 = vld [vmem:[#allocation4 + $0xe4] sm:$0xf] }
  0x4b   : > { %v3463_v3 = vor.u32 %v4671_v1, %v3462_v0  ;;  %v3464_v4 = vld [vmem:[#allocation4 + $0xf0] sm:$0xf0]  ;;  %v3470_v5 = vld [vmem:[#allocation4 + $0xe8] sm:$0xf]  ;;  %v4672_v6 = vld [vmem:[#allocation4 + $0xf4] sm:$0xf0] }
  0x4c   : > { %v3467_v7 = vor.u32 %v4669_v2, %v3464_v4  ;;  %v3471_v8 = vor.u32 %v4672_v6, %v3470_v5  ;;  %v4670_v9 = vld [vmem:[#allocation4 + $0xec] sm:$0xf]  ;;  %v3472_v10 = vld [vmem:[#allocation4 + $0xf8] sm:$0xf0]  ;;  %v3446_v11 = vld [vmem:[#allocation4 + $0xc0] sm:$0xf] }
  0x4d   : > { %732 = vmatpush.bf16.msra.mxu0 %v3463_v3  ;;  %v3475_v12 = vor.u32 %v4670_v9, %v3472_v10  ;;  %v4667_v13 = vld [vmem:[#allocation4 + $0xcc] sm:$0xf0]  ;;  %v4665_v14 = vld [vmem:[#allocation4 + $0xc4] sm:$0xf]  ;;  %v3448_v15 = vld [vmem:[#allocation4 + $0xd0] sm:$0xf0] }
  0x4e   : > { %745 = vmatpush.bf16.msra.mxu1 %v3467_v7  ;;  %758 = vmatpush.bf16.msra.mxu2 %v3471_v8  ;;  %v3447_v16 = vor.u32 %v4667_v13, %v3446_v11  ;;  %v3451_v17 = vor.u32 %v4665_v14, %v3448_v15  ;;  %v3454_v18 = vld [vmem:[#allocation4 + $0xc8] sm:$0xf]  ;;  %v4668_v19 = vld [vmem:[#allocation4 + $0xd4] sm:$0xf0]  ;;  %v4666_v20 = vld [vmem:[#allocation4 + $0xcc] sm:$0xf] }
  0x4f   : > { %771 = vmatpush.bf16.msra.mxu3 %v3475_v12  ;;  %v3455_v21 = vor.u32 %v4668_v19, %v3454_v18  ;;  %v3456_v22 = vld [vmem:[#allocation4 + $0xd8] sm:$0xf0]  ;;  %v3430_v23 = vld [vmem:[#allocation4 + $0xa0] sm:$0xf]  ;;  %v4663_v24 = vld [vmem:[#allocation4 + $0xac] sm:$0xf0] }
  0x50   : > { %v3459_v25 = vor.u32 %v4666_v20, %v3456_v22  ;;  %v4661_v26 = vld [vmem:[#allocation4 + $0xa4] sm:$0xf]  ;;  %v3432_v27 = vld [vmem:[#allocation4 + $0xb0] sm:$0xf0]  ;;  %v3438_v28 = vld [vmem:[#allocation4 + $0xa8] sm:$0xf]  ;;  %v3431_v29 = vor.u32 %v4663_v24, %v3430_v23 }
  0x51   : > { %733 = vmatpush.bf16.msra.mxu0 %v3447_v16  ;;  %v4664_v30 = vld [vmem:[#allocation4 + $0xb4] sm:$0xf0]  ;;  %v4662_v31 = vld [vmem:[#allocation4 + $0xac] sm:$0xf]  ;;  %v3440_v32 = vld [vmem:[#allocation4 + $0xb8] sm:$0xf0]  ;;  %v3435_v33 = vor.u32 %v4661_v26, %v3432_v27 }
  0x52   : > { %746 = vmatpush.bf16.msra.mxu1 %v3451_v17  ;;  %759 = vmatpush.bf16.msra.mxu2 %v3455_v21  ;;  %v3439_v34 = vor.u32 %v4664_v30, %v3438_v28  ;;  %v3414_v35 = vld [vmem:[#allocation4 + $0x80] sm:$0xf]  ;;  %v4659_v36 = vld [vmem:[#allocation4 + $0x8c] sm:$0xf0]  ;;  %v4657_v37 = vld [vmem:[#allocation4 + $0x84] sm:$0xf]  ;;  %v3443_v38 = vor.u32 %v4662_v31, %v3440_v32 }
  0x53   : > { %772 = vmatpush.bf16.msra.mxu3 %v3459_v25  ;;  %v3416_v39 = vld [vmem:[#allocation4 + $0x90] sm:$0xf0]  ;;  %v3422_v40 = vld [vmem:[#allocation4 + $0x88] sm:$0xf]  ;;  %v4660_v41 = vld [vmem:[#allocation4 + $0x94] sm:$0xf0]  ;;  %v3415_v44 = vor.u32 %v4659_v36, %v3414_v35 }
  0x54   : > { %v4658_v42 = vld [vmem:[#allocation4 + $0x8c] sm:$0xf]  ;;  %v3424_v43 = vld [vmem:[#allocation4 + $0x98] sm:$0xf0]  ;;  %v3419_v45 = vor.u32 %v4657_v37, %v3416_v39  ;;  %v3423_v46 = vor.u32 %v4660_v41, %v3422_v40  ;;  %v3398_v47 = vld [vmem:[#allocation4 + $0x60] sm:$0xf] }
  0x55   : > { %734 = vmatpush.bf16.msra.mxu0 %v3431_v29  ;;  %v4655_v48 = vld [vmem:[#allocation4 + $0x6c] sm:$0xf0]  ;;  %v4653_v49 = vld [vmem:[#allocation4 + $0x64] sm:$0xf]  ;;  %v3427_v50 = vor.u32 %v4658_v42, %v3424_v43  ;;  %v3400_v51 = vld [vmem:[#allocation4 + $0x70] sm:$0xf0] }
  0x56   : > { %747 = vmatpush.bf16.msra.mxu1 %v3435_v33  ;;  %760 = vmatpush.bf16.msra.mxu2 %v3439_v34  ;;  %v3406_v52 = vld [vmem:[#allocation4 + $0x68] sm:$0xf]  ;;  %v4656_v53 = vld [vmem:[#allocation4 + $0x74] sm:$0xf0]  ;;  %v4654_v54 = vld [vmem:[#allocation4 + $0x6c] sm:$0xf]  ;;  %v3399_v56 = vor.u32 %v4655_v48, %v3398_v47  ;;  %v3403_v57 = vor.u32 %v4653_v49, %v3400_v51 }
  0x57   : > { %773 = vmatpush.bf16.msra.mxu3 %v3443_v38  ;;  %v3408_v55 = vld [vmem:[#allocation4 + $0x78] sm:$0xf0]  ;;  %v3407_v58 = vor.u32 %v4656_v53, %v3406_v52  ;;  %v3382_v59 = vld [vmem:[#allocation4 + $0x40] sm:$0xf]  ;;  %v4651_v60 = vld [vmem:[#allocation4 + $0x4c] sm:$0xf0] }
  0x58   : > { %v4649_v61 = vld [vmem:[#allocation4 + $0x44] sm:$0xf]  ;;  %v3411_v62 = vor.u32 %v4654_v54, %v3408_v55  ;;  %v3384_v63 = vld [vmem:[#allocation4 + $0x50] sm:$0xf0]  ;;  %v3390_v0 = vld [vmem:[#allocation4 + $0x48] sm:$0xf]  ;;  %v3383_v4 = vor.u32 %v4651_v60, %v3382_v59 }
  0x59   : > { %735 = vmatpush.bf16.msra.mxu0 %v3415_v44  ;;  %v4652_v1 = vld [vmem:[#allocation4 + $0x54] sm:$0xf0]  ;;  %v4650_v2 = vld [vmem:[#allocation4 + $0x4c] sm:$0xf]  ;;  %v3392_v3 = vld [vmem:[#allocation4 + $0x58] sm:$0xf0]  ;;  %v3387_v5 = vor.u32 %v4649_v61, %v3384_v63 }
  0x5a   : > { %748 = vmatpush.bf16.msra.mxu1 %v3419_v45  ;;  %761 = vmatpush.bf16.msra.mxu2 %v3423_v46  ;;  %v3391_v6 = vor.u32 %v4652_v1, %v3390_v0  ;;  %v3366_v7 = vld [vmem:[#allocation4 + $0x20] sm:$0xf]  ;;  %v4647_v8 = vld [vmem:[#allocation4 + $0x2c] sm:$0xf0]  ;;  %v4645_v9 = vld [vmem:[#allocation4 + $0x24] sm:$0xf]  ;;  %v3395_v10 = vor.u32 %v4650_v2, %v3392_v3 }
  0x5b   : > { %774 = vmatpush.bf16.msra.mxu3 %v3427_v50  ;;  %v3368_v11 = vld [vmem:[#allocation4 + $0x30] sm:$0xf0]  ;;  %v3374_v12 = vld [vmem:[#allocation4 + $0x28] sm:$0xf]  ;;  %v4648_v13 = vld [vmem:[#allocation4 + $0x34] sm:$0xf0]  ;;  %v3367_v16 = vor.u32 %v4647_v8, %v3366_v7 }
  0x5c   : > { %v4646_v14 = vld [vmem:[#allocation4 + $0x2c] sm:$0xf]  ;;  %v3376_v15 = vld [vmem:[#allocation4 + $0x38] sm:$0xf0]  ;;  %v3371_v17 = vor.u32 %v4645_v9, %v3368_v11  ;;  %v3375_v18 = vor.u32 %v4648_v13, %v3374_v12  ;;  %v3350_v19 = vld [vmem:[#allocation4] sm:$0xf] }
  0x5d   : > { %736 = vmatpush.bf16.msra.mxu0 %v3399_v56  ;;  %v4643_v20 = vld [vmem:[#allocation4 + $0xc] sm:$0xf0]  ;;  %v4641_v21 = vld [vmem:[#allocation4 + $0x4] sm:$0xf]  ;;  %v3379_v22 = vor.u32 %v4646_v14, %v3376_v15  ;;  %v3352_v23 = vld [vmem:[#allocation4 + $0x10] sm:$0xf0] }
  0x5e   : > { %749 = vmatpush.bf16.msra.mxu1 %v3403_v57  ;;  %762 = vmatpush.bf16.msra.mxu2 %v3407_v58  ;;  %v3358_v24 = vld [vmem:[#allocation4 + $0x8] sm:$0xf]  ;;  %v4644_v25 = vld [vmem:[#allocation4 + $0x14] sm:$0xf0]  ;;  %v4642_v26 = vld [vmem:[#allocation4 + $0xc] sm:$0xf]  ;;  %v3351_v28 = vor.u32 %v4643_v20, %v3350_v19  ;;  %v3355_v29 = vor.u32 %v4641_v21, %v3352_v23 }
  0x5f   : > { %775 = vmatpush.bf16.msra.mxu3 %v3411_v62  ;;  %v3360_v27 = vld [vmem:[#allocation4 + $0x18] sm:$0xf0]  ;;  %v3359_v30 = vor.u32 %v4644_v25, %v3358_v24  ;;  %v529_v32 = vld [vmem:[%s5795_s0] sm:$0xf] }
  0x60   : > { %v3363_v31 = vor.u32 %v4642_v26, %v3360_v27  ;;  %v562_v33 = vld [vmem:[%s5797_s2] sm:$0xf] }
  0x61   : > { %737 = vmatpush.bf16.msra.mxu0 %v3383_v4  ;;  %v564_v34 = vperm.slane %v562_v33, 0  ;;  %v565_v35 = vperm.slane %v562_v33, 1  ;;  %v566_v42 = vperm.slane %v562_v33, 2  ;;  %v567_v43 = vperm.slane %v562_v33, 3 }
  0x62   : > { %750 = vmatpush.bf16.msra.mxu1 %v3387_v5  ;;  %763 = vmatpush.bf16.msra.mxu2 %v3391_v6 }
  0x63   : > { %776 = vmatpush.bf16.msra.mxu3 %v3395_v10 }
  0x65   : > { %738 = vmatpush.bf16.msra.mxu0 %v3367_v16 }
  0x66   : > { %751 = vmatpush.bf16.msra.mxu1 %v3371_v17  ;;  %764 = vmatpush.bf16.msra.mxu2 %v3375_v18 }
  0x67   : > { %777 = vmatpush.bf16.msra.mxu3 %v3379_v22 }
  0x69   : > { %739 = vmatpush.bf16.msra.mxu0 %v3351_v28 }
  0x6a   : > { %752 = vmatpush.bf16.msra.mxu1 %v3355_v29  ;;  %765 = vmatpush.bf16.msra.mxu2 %v3359_v30 }
  0x6b   : > { %778 = vmatpush.bf16.msra.mxu3 %v3363_v31 }
  0x6c   : > { %740 = vmatmul.bf16.vlgmr.msra.gmra.mxu0 %v529_v32 }
  0x6d   : > { %753 = vmatmul.bf16.vlgmr.msra.gmra.mxu1 %v529_v32  ;;  %766 = vmatmul.bf16.vlgmr.msra.gmra.mxu2 %v529_v32 }
  0x6e   : > { %779 = vmatmul.bf16.vlgmr.msra.gmra.mxu3 %v529_v32 }
  0xe9   : > { %v741_v36 = vpop.f32.mrf.mxu0 }
  0xea   : > { %v742_v37 = vadd.f32 %v741_v36, %v564_v34  ;;  %v754_v38 = vpop.f32.mrf.mxu1 }
  0xeb   : > { %v755_v39 = vadd.f32 %v754_v38, %v565_v35 }
  0xec   : > { %v784_v40 = vmax.f32 %v742_v37, 0.0 }
  0xed   : > { %v785_v41 = vmax.f32 %v755_v39, 0.0 }
  0xef   : > { %v788_v44 = vpack.c.bf16 %v785_v41, %v784_v40 }
  0xf0   : > { %v767_v45 = vpop.f32.mrf.mxu2 }
  0xf1   : > { %790 = vst [vmem:[#allocation2] sm:$0xff] %v788_v44  ;;  %v768_v46 = vadd.f32 %v767_v45, %v566_v42  ;;  %v780_v47 = vpop.f32.mrf.mxu3  ;;  %v743_v48 = vpop.f32.mrf.mxu0 }
  0xf2   : > { %v781_v49 = vadd.f32 %v780_v47, %v567_v43  ;;  %v756_v50 = vpop.f32.mrf.mxu1 }
  0xf3   : > { %v786_v51 = vmax.f32 %v768_v46, 0.0 }
  0xf4   : > { %v787_v52 = vmax.f32 %v781_v49, 0.0 }
  0xf6   : > { %v789_v53 = vpack.c.bf16 %v787_v52, %v786_v51 }
  0xf8   : > { %791 = vst [vmem:[#allocation2 + $0x8] sm:$0xff] %v789_v53  ;;  %v769_v54 = vpop.f32.mrf.mxu2 }
  0xf9   : > { %v782_v55 = vpop.f32.mrf.mxu3 }
  0xfa PF: > { %p3476_p13 = scmp.ge.s32.totalorder %s5358_s15, 1 }
  0xfb   : > { %s4801_s18 = sshll.u32 (!%p3476_p13), %s5358_s15, 4 }
  0xfc   : > { %795 = sbr.rel (%p3476_p13) target bundleno = 530 (0x212), region = 80  ;;  %s5734_s27 = scalar_lea.vmem (!%p3476_p13), [#allocation3], %s4801_s18 }
 0x101   : > { %v3591_v56 = vld [vmem:[%s5422_s24 + $0xe0] sm:$0xf]  ;;  %v4703_v57 = vld [vmem:[%s5422_s24 + $0xec] sm:$0xf0] }
 0x102   : > { %v3719_v58 = vld [vmem:[%s5422_s24 + $0x1e0] sm:$0xf]  ;;  %v3592_v59 = vor.u32 %v4703_v57, %v3591_v56  ;;  %v4735_v60 = vld [vmem:[%s5422_s24 + $0x1ec] sm:$0xf0] }
 0x103   : > { %v3847_v61 = vld [vmem:[%s5422_s24 + $0x2e0] sm:$0xf]  ;;  %v4767_v62 = vld [vmem:[%s5422_s24 + $0x2ec] sm:$0xf0]  ;;  %v3720_v63 = vor.u32 %v4735_v60, %v3719_v58 }
 0x104   : > { %v3848_v0 = vor.u32 %v4767_v62, %v3847_v61  ;;  %v3975_v1 = vld [vmem:[%s5422_s24 + $0x3e0] sm:$0xf]  ;;  %v4799_v2 = vld [vmem:[%s5422_s24 + $0x3ec] sm:$0xf0]  ;;  %1590 = vmatpush.bf16.msra.mxu0 %v3592_v59 }
 0x105   : > { %v3575_v3 = vld [vmem:[%s5422_s24 + $0xc0] sm:$0xf]  ;;  %v3976_v4 = vor.u32 %v4799_v2, %v3975_v1  ;;  %v4699_v5 = vld [vmem:[%s5422_s24 + $0xcc] sm:$0xf0]  ;;  %1603 = vmatpush.bf16.msra.mxu1 %v3720_v63 }
 0x106   : > { %v3703_v6 = vld [vmem:[%s5422_s24 + $0x1c0] sm:$0xf]  ;;  %v4731_v7 = vld [vmem:[%s5422_s24 + $0x1cc] sm:$0xf0]  ;;  %1616 = vmatpush.bf16.msra.mxu2 %v3848_v0  ;;  %v3576_v8 = vor.u32 %v4699_v5, %v3575_v3 }
 0x107   : > { %v3704_v9 = vor.u32 %v4731_v7, %v3703_v6  ;;  %v3831_v10 = vld [vmem:[%s5422_s24 + $0x2c0] sm:$0xf]  ;;  %v4763_v11 = vld [vmem:[%s5422_s24 + $0x2cc] sm:$0xf0]  ;;  %1629 = vmatpush.bf16.msra.mxu3 %v3976_v4 }
 0x108   : > { %v3959_v12 = vld [vmem:[%s5422_s24 + $0x3c0] sm:$0xf]  ;;  %v3832_v13 = vor.u32 %v4763_v11, %v3831_v10  ;;  %v4795_v14 = vld [vmem:[%s5422_s24 + $0x3cc] sm:$0xf0]  ;;  %1591 = vmatpush.bf16.msra.mxu0 %v3576_v8 }
 0x109   : > { %v3559_v15 = vld [vmem:[%s5422_s24 + $0xa0] sm:$0xf]  ;;  %v4695_v16 = vld [vmem:[%s5422_s24 + $0xac] sm:$0xf0]  ;;  %v3960_v17 = vor.u32 %v4795_v14, %v3959_v12  ;;  %1604 = vmatpush.bf16.msra.mxu1 %v3704_v9 }
 0x10a   : > { %v3687_v18 = vld [vmem:[%s5422_s24 + $0x1a0] sm:$0xf]  ;;  %v4727_v19 = vld [vmem:[%s5422_s24 + $0x1ac] sm:$0xf0]  ;;  %v3560_v21 = vor.u32 %v4695_v16, %v3559_v15  ;;  %1617 = vmatpush.bf16.msra.mxu2 %v3832_v13 }
 0x10b   : > { %v3815_v20 = vld [vmem:[%s5422_s24 + $0x2a0] sm:$0xf]  ;;  %v4759_v22 = vld [vmem:[%s5422_s24 + $0x2ac] sm:$0xf0]  ;;  %v3688_v25 = vor.u32 %v4727_v19, %v3687_v18  ;;  %1630 = vmatpush.bf16.msra.mxu3 %v3960_v17 }
 0x10c   : > { %v3943_v23 = vld [vmem:[%s5422_s24 + $0x3a0] sm:$0xf]  ;;  %v4791_v24 = vld [vmem:[%s5422_s24 + $0x3ac] sm:$0xf0]  ;;  %v3816_v26 = vor.u32 %v4759_v22, %v3815_v20  ;;  %1592 = vmatpush.bf16.msra.mxu0 %v3560_v21  ;;  %v4701_v20 = vld [vmem:[%s5422_s24 + $0xe4] sm:$0xf] }
 0x10d   : > { %v3543_v27 = vld [vmem:[%s5422_s24 + $0x80] sm:$0xf]  ;;  %v4691_v28 = vld [vmem:[%s5422_s24 + $0x8c] sm:$0xf0]  ;;  %v3944_v30 = vor.u32 %v4791_v24, %v3943_v23  ;;  %1605 = vmatpush.bf16.msra.mxu1 %v3688_v25  ;;  %v3593_v21 = vld [vmem:[%s5422_s24 + $0xf0] sm:$0xf0] }
 0x10e   : > { %v3671_v29 = vld [vmem:[%s5422_s24 + $0x180] sm:$0xf]  ;;  %v4723_v31 = vld [vmem:[%s5422_s24 + $0x18c] sm:$0xf0]  ;;  %v3544_v36 = vor.u32 %v4691_v28, %v3543_v27  ;;  %1618 = vmatpush.bf16.msra.mxu2 %v3816_v26  ;;  %v4733_v22 = vld [vmem:[%s5422_s24 + $0x1e4] sm:$0xf] }
 0x10f   : > { %v3799_v32 = vld [vmem:[%s5422_s24 + $0x280] sm:$0xf]  ;;  %v4755_v33 = vld [vmem:[%s5422_s24 + $0x28c] sm:$0xf0]  ;;  %v3672_v37 = vor.u32 %v4723_v31, %v3671_v29  ;;  %1631 = vmatpush.bf16.msra.mxu3 %v3944_v30  ;;  %v3721_v24 = vld [vmem:[%s5422_s24 + $0x1f0] sm:$0xf0] }
 0x110   : > { %v3927_v34 = vld [vmem:[%s5422_s24 + $0x380] sm:$0xf]  ;;  %v4787_v35 = vld [vmem:[%s5422_s24 + $0x38c] sm:$0xf0]  ;;  %v3800_v38 = vor.u32 %v4755_v33, %v3799_v32  ;;  %1593 = vmatpush.bf16.msra.mxu0 %v3544_v36  ;;  %v4765_v25 = vld [vmem:[%s5422_s24 + $0x2e4] sm:$0xf]  ;;  %v3596_v32 = vor.u32 %v4701_v20, %v3593_v21  ;;  %v3724_v33 = vor.u32 %v4733_v22, %v3721_v24 }
 0x111   : > { %v3527_v39 = vld [vmem:[%s5422_s24 + $0x60] sm:$0xf]  ;;  %v4687_v40 = vld [vmem:[%s5422_s24 + $0x6c] sm:$0xf0]  ;;  %v3928_v42 = vor.u32 %v4787_v35, %v3927_v34  ;;  %1606 = vmatpush.bf16.msra.mxu1 %v3672_v37  ;;  %v3849_v26 = vld [vmem:[%s5422_s24 + $0x2f0] sm:$0xf0] }
 0x112   : > { %v3655_v41 = vld [vmem:[%s5422_s24 + $0x160] sm:$0xf]  ;;  %v4719_v43 = vld [vmem:[%s5422_s24 + $0x16c] sm:$0xf0]  ;;  %v3528_v48 = vor.u32 %v4687_v40, %v3527_v39  ;;  %1619 = vmatpush.bf16.msra.mxu2 %v3800_v38  ;;  %v4797_v29 = vld [vmem:[%s5422_s24 + $0x3e4] sm:$0xf]  ;;  %v3852_v34 = vor.u32 %v4765_v25, %v3849_v26 }
 0x113   : > { %v3783_v44 = vld [vmem:[%s5422_s24 + $0x260] sm:$0xf]  ;;  %v4751_v45 = vld [vmem:[%s5422_s24 + $0x26c] sm:$0xf0]  ;;  %v3656_v49 = vor.u32 %v4719_v43, %v3655_v41  ;;  %1632 = vmatpush.bf16.msra.mxu3 %v3928_v42  ;;  %v3977_v30 = vld [vmem:[%s5422_s24 + $0x3f0] sm:$0xf0] }
 0x114   : > { %v3911_v46 = vld [vmem:[%s5422_s24 + $0x360] sm:$0xf]  ;;  %v4783_v47 = vld [vmem:[%s5422_s24 + $0x36c] sm:$0xf0]  ;;  %v3784_v50 = vor.u32 %v4751_v45, %v3783_v44  ;;  %1594 = vmatpush.bf16.msra.mxu0 %v3528_v48  ;;  %v4697_v35 = vld [vmem:[%s5422_s24 + $0xc4] sm:$0xf]  ;;  %v3980_v38 = vor.u32 %v4797_v29, %v3977_v30 }
 0x115   : > { %v3511_v51 = vld [vmem:[%s5422_s24 + $0x40] sm:$0xf]  ;;  %v4683_v52 = vld [vmem:[%s5422_s24 + $0x4c] sm:$0xf0]  ;;  %v3912_v54 = vor.u32 %v4783_v47, %v3911_v46  ;;  %1607 = vmatpush.bf16.msra.mxu1 %v3656_v49  ;;  %v3577_v36 = vld [vmem:[%s5422_s24 + $0xd0] sm:$0xf0] }
 0x116   : > { %v3639_v53 = vld [vmem:[%s5422_s24 + $0x140] sm:$0xf]  ;;  %v4715_v55 = vld [vmem:[%s5422_s24 + $0x14c] sm:$0xf0]  ;;  %v3512_v60 = vor.u32 %v4683_v52, %v3511_v51  ;;  %1620 = vmatpush.bf16.msra.mxu2 %v3784_v50  ;;  %v4729_v37 = vld [vmem:[%s5422_s24 + $0x1c4] sm:$0xf]  ;;  %v3580_v45 = vor.u32 %v4697_v35, %v3577_v36 }
 0x117   : > { %v3767_v56 = vld [vmem:[%s5422_s24 + $0x240] sm:$0xf]  ;;  %v4747_v57 = vld [vmem:[%s5422_s24 + $0x24c] sm:$0xf0]  ;;  %v3640_v61 = vor.u32 %v4715_v55, %v3639_v53  ;;  %1633 = vmatpush.bf16.msra.mxu3 %v3912_v54  ;;  %v3705_v39 = vld [vmem:[%s5422_s24 + $0x1d0] sm:$0xf0] }
 0x118   : > { %v3895_v58 = vld [vmem:[%s5422_s24 + $0x340] sm:$0xf]  ;;  %v4779_v59 = vld [vmem:[%s5422_s24 + $0x34c] sm:$0xf0]  ;;  %v3768_v62 = vor.u32 %v4747_v57, %v3767_v56  ;;  %1595 = vmatpush.bf16.msra.mxu0 %v3512_v60  ;;  %v4761_v40 = vld [vmem:[%s5422_s24 + $0x2c4] sm:$0xf]  ;;  %v3708_v49 = vor.u32 %v4729_v37, %v3705_v39 }
 0x119   : > { %v3495_v63 = vld [vmem:[%s5422_s24 + $0x20] sm:$0xf]  ;;  %v4679_v0 = vld [vmem:[%s5422_s24 + $0x2c] sm:$0xf0]  ;;  %v3896_v2 = vor.u32 %v4779_v59, %v3895_v58  ;;  %1608 = vmatpush.bf16.msra.mxu1 %v3640_v61  ;;  %v3833_v41 = vld [vmem:[%s5422_s24 + $0x2d0] sm:$0xf0] }
 0x11a   : > { %v3623_v1 = vld [vmem:[%s5422_s24 + $0x120] sm:$0xf]  ;;  %v4711_v3 = vld [vmem:[%s5422_s24 + $0x12c] sm:$0xf0]  ;;  %v3496_v8 = vor.u32 %v4679_v0, %v3495_v63  ;;  %1621 = vmatpush.bf16.msra.mxu2 %v3768_v62  ;;  %v4793_v42 = vld [vmem:[%s5422_s24 + $0x3c4] sm:$0xf]  ;;  %v3836_v50 = vor.u32 %v4761_v40, %v3833_v41 }
 0x11b   : > { %v3751_v4 = vld [vmem:[%s5422_s24 + $0x220] sm:$0xf]  ;;  %v4743_v5 = vld [vmem:[%s5422_s24 + $0x22c] sm:$0xf0]  ;;  %v3624_v11 = vor.u32 %v4711_v3, %v3623_v1  ;;  %1634 = vmatpush.bf16.msra.mxu3 %v3896_v2  ;;  %v3961_v43 = vld [vmem:[%s5422_s24 + $0x3d0] sm:$0xf0] }
 0x11c   : > { %v3879_v6 = vld [vmem:[%s5422_s24 + $0x320] sm:$0xf]  ;;  %v4775_v7 = vld [vmem:[%s5422_s24 + $0x32c] sm:$0xf0]  ;;  %v3752_v12 = vor.u32 %v4743_v5, %v3751_v4  ;;  %1596 = vmatpush.bf16.msra.mxu0 %v3496_v8  ;;  %v798_v44 = vld [vmem:[#allocation2 + $0x8] sm:$0xff]  ;;  %v3964_v54 = vor.u32 %v4793_v42, %v3961_v43 }
 0x11d   : > { %v3479_v9 = vld [vmem:[%s5422_s24] sm:$0xf]  ;;  %v4675_v10 = vld [vmem:[%s5422_s24 + $0xc] sm:$0xf0]  ;;  %v3880_v16 = vor.u32 %v4775_v7, %v3879_v6  ;;  %1609 = vmatpush.bf16.msra.mxu1 %v3624_v11  ;;  %v4693_v46 = vld [vmem:[%s5422_s24 + $0xa4] sm:$0xf]  ;;  %v940_v47 = vunpack.c.l.b16 %v798_v44  ;;  %v941_v48 = vunpack.c.h.b16 %v798_v44 }
 0x11e   : > { %v3607_v13 = vld [vmem:[%s5422_s24 + $0x100] sm:$0xf]  ;;  %v4707_v14 = vld [vmem:[%s5422_s24 + $0x10c] sm:$0xf0]  ;;  %v3480_v23 = vor.u32 %v4675_v10, %v3479_v9  ;;  %1622 = vmatpush.bf16.msra.mxu2 %v3752_v12  ;;  %v3561_v51 = vld [vmem:[%s5422_s24 + $0xb0] sm:$0xf0] }
 0x11f   : > { %v3735_v15 = vld [vmem:[%s5422_s24 + $0x200] sm:$0xf]  ;;  %v4739_v17 = vld [vmem:[%s5422_s24 + $0x20c] sm:$0xf0]  ;;  %v3608_v27 = vor.u32 %v4707_v14, %v3607_v13  ;;  %1635 = vmatpush.bf16.msra.mxu3 %v3880_v16  ;;  %v4725_v52 = vld [vmem:[%s5422_s24 + $0x1a4] sm:$0xf]  ;;  %v5538_v57 = vpack.c.b16 %v940_v47, %v940_v47  ;;  %v5542_v62 = vpack.c.b16 %v941_v48, %v941_v48  ;;  %v3564_v0 = vor.u32 %v4693_v46, %v3561_v51 }
 0x120   : > { %v3863_v18 = vld [vmem:[%s5422_s24 + $0x300] sm:$0xf]  ;;  %v4771_v19 = vld [vmem:[%s5422_s24 + $0x30c] sm:$0xf0]  ;;  %v3736_v28 = vor.u32 %v4739_v17, %v3735_v15  ;;  %1597 = vmatpush.bf16.msra.mxu0 %v3480_v23  ;;  %v3689_v53 = vld [vmem:[%s5422_s24 + $0x1b0] sm:$0xf0] }
 0x121   : > { %v3864_v31 = vor.u32 %v4771_v19, %v3863_v18  ;;  %1610 = vmatpush.bf16.msra.mxu1 %v3608_v27  ;;  %v4757_v55 = vld [vmem:[%s5422_s24 + $0x2a4] sm:$0xf]  ;;  %v3817_v56 = vld [vmem:[%s5422_s24 + $0x2b0] sm:$0xf0]  ;;  %v3692_v1 = vor.u32 %v4725_v52, %v3689_v53 }
 0x122   : > { %1623 = vmatpush.bf16.msra.mxu2 %v3736_v28  ;;  %v797_v58 = vld [vmem:[#allocation2] sm:$0xff]  ;;  %v3945_v60 = vld [vmem:[%s5422_s24 + $0x3b0] sm:$0xf0]  ;;  %v3820_v2 = vor.u32 %v4757_v55, %v3817_v56 }
 0x123   : > { %1636 = vmatpush.bf16.msra.mxu3 %v3864_v31  ;;  %v4789_v59 = vld [vmem:[%s5422_s24 + $0x3a4] sm:$0xf]  ;;  %v938_v61 = vunpack.c.l.b16 %v797_v58  ;;  %v939_v63 = vunpack.c.h.b16 %v797_v58  ;;  %v3545_v4 = vld [vmem:[%s5422_s24 + $0x90] sm:$0xf0] }
 0x124   : > { %1642 = vmatpush.bf16.msrb.mxu0 %v3596_v32  ;;  %v4689_v3 = vld [vmem:[%s5422_s24 + $0x84] sm:$0xf]  ;;  %v3948_v8 = vor.u32 %v4789_v59, %v3945_v60  ;;  %v3673_v9 = vld [vmem:[%s5422_s24 + $0x190] sm:$0xf0] }
 0x125   : > { %1655 = vmatpush.bf16.msrb.mxu1 %v3724_v33  ;;  %1624 = vmatmul.bf16.vlgmr.msra.gmra.mxu2 %v5538_v57  ;;  %v4721_v5 = vld [vmem:[%s5422_s24 + $0x184] sm:$0xf]  ;;  %v5548_v6 = vpack.c.b16 %v938_v61, %v938_v61  ;;  %v5550_v7 = vpack.c.b16 %v939_v63, %v939_v63  ;;  %v3801_v11 = vld [vmem:[%s5422_s24 + $0x290] sm:$0xf0]  ;;  %v3548_v14 = vor.u32 %v4689_v3, %v3545_v4  ;;  %v4736_v4 = vld [vmem:[%s5422_s24 + $0x1f4] sm:$0xf0] }
 0x126   : > { %1668 = vmatpush.bf16.msrb.mxu2 %v3852_v34  ;;  %v4753_v10 = vld [vmem:[%s5422_s24 + $0x284] sm:$0xf]  ;;  %v3929_v13 = vld [vmem:[%s5422_s24 + $0x390] sm:$0xf0]  ;;  %1637 = vmatmul.bf16.vlgmr.msra.gmra.mxu3 %v5542_v62  ;;  %v3676_v15 = vor.u32 %v4721_v5, %v3673_v9  ;;  %v3855_v5 = vld [vmem:[%s5422_s24 + $0x2e8] sm:$0xf] }
 0x127   : > { %1681 = vmatpush.bf16.msrb.mxu3 %v3980_v38  ;;  %v4785_v12 = vld [vmem:[%s5422_s24 + $0x384] sm:$0xf]  ;;  %1598 = vmatmul.bf16.vlgmr.msra.gmra.mxu0 %v5548_v6  ;;  %v3804_v16 = vor.u32 %v4753_v10, %v3801_v11  ;;  %v3529_v18 = vld [vmem:[%s5422_s24 + $0x70] sm:$0xf0]  ;;  %v3983_v11 = vld [vmem:[%s5422_s24 + $0x3e8] sm:$0xf] }
 0x128   : > { %1643 = vmatpush.bf16.msrb.mxu0 %v3580_v45  ;;  %1611 = vmatmul.bf16.vlgmr.msra.gmra.mxu1 %v5550_v7  ;;  %v4685_v17 = vld [vmem:[%s5422_s24 + $0x64] sm:$0xf]  ;;  %v3932_v20 = vor.u32 %v4785_v12, %v3929_v13  ;;  %v3657_v21 = vld [vmem:[%s5422_s24 + $0x170] sm:$0xf0]  ;;  %v4800_v12 = vld [vmem:[%s5422_s24 + $0x3f4] sm:$0xf0] }
 0x129   : > { %1656 = vmatpush.bf16.msrb.mxu1 %v3708_v49  ;;  %v4717_v19 = vld [vmem:[%s5422_s24 + $0x164] sm:$0xf]  ;;  %v3785_v23 = vld [vmem:[%s5422_s24 + $0x270] sm:$0xf0]  ;;  %v3532_v26 = vor.u32 %v4685_v17, %v3529_v18  ;;  %v3583_v17 = vld [vmem:[%s5422_s24 + $0xc8] sm:$0xf] }
 0x12a   : > { %1669 = vmatpush.bf16.msrb.mxu2 %v3836_v50  ;;  %v4749_v22 = vld [vmem:[%s5422_s24 + $0x264] sm:$0xf]  ;;  %v3913_v25 = vld [vmem:[%s5422_s24 + $0x370] sm:$0xf0]  ;;  %v3660_v27 = vor.u32 %v4717_v19, %v3657_v21  ;;  %v4700_v18 = vld [vmem:[%s5422_s24 + $0xd4] sm:$0xf0] }
 0x12b   : > { %1682 = vmatpush.bf16.msrb.mxu3 %v3964_v54  ;;  %v4781_v24 = vld [vmem:[%s5422_s24 + $0x364] sm:$0xf]  ;;  %v3788_v28 = vor.u32 %v4749_v22, %v3785_v23  ;;  %v3513_v30 = vld [vmem:[%s5422_s24 + $0x50] sm:$0xf0]  ;;  %v3711_v19 = vld [vmem:[%s5422_s24 + $0x1c8] sm:$0xf] }
 0x12c   : > { %1644 = vmatpush.bf16.msrb.mxu0 %v3564_v0  ;;  %v4681_v29 = vld [vmem:[%s5422_s24 + $0x44] sm:$0xf]  ;;  %v3916_v32 = vor.u32 %v4781_v24, %v3913_v25  ;;  %v3641_v33 = vld [vmem:[%s5422_s24 + $0x150] sm:$0xf0]  ;;  %v3599_v0 = vld [vmem:[%s5422_s24 + $0xe8] sm:$0xf] }
 0x12d   : > { %1657 = vmatpush.bf16.msrb.mxu1 %v3692_v1  ;;  %v4713_v31 = vld [vmem:[%s5422_s24 + $0x144] sm:$0xf]  ;;  %v3769_v35 = vld [vmem:[%s5422_s24 + $0x250] sm:$0xf0]  ;;  %v3516_v38 = vor.u32 %v4681_v29, %v3513_v30  ;;  %v4704_v1 = vld [vmem:[%s5422_s24 + $0xf4] sm:$0xf0] }
 0x12e   : > { %1670 = vmatpush.bf16.msrb.mxu2 %v3820_v2  ;;  %v4745_v34 = vld [vmem:[%s5422_s24 + $0x244] sm:$0xf]  ;;  %v3897_v37 = vld [vmem:[%s5422_s24 + $0x350] sm:$0xf0]  ;;  %v3644_v39 = vor.u32 %v4713_v31, %v3641_v33  ;;  %v3727_v2 = vld [vmem:[%s5422_s24 + $0x1e8] sm:$0xf] }
 0x12f   : > { %1683 = vmatpush.bf16.msrb.mxu3 %v3948_v8  ;;  %v4777_v36 = vld [vmem:[%s5422_s24 + $0x344] sm:$0xf]  ;;  %v3772_v40 = vor.u32 %v4745_v34, %v3769_v35  ;;  %v3497_v42 = vld [vmem:[%s5422_s24 + $0x30] sm:$0xf0]  ;;  %v4768_v8 = vld [vmem:[%s5422_s24 + $0x2f4] sm:$0xf0] }
 0x130   : > { %1645 = vmatpush.bf16.msrb.mxu0 %v3548_v14  ;;  %v4677_v41 = vld [vmem:[%s5422_s24 + $0x24] sm:$0xf]  ;;  %v3900_v44 = vor.u32 %v4777_v36, %v3897_v37  ;;  %v3625_v45 = vld [vmem:[%s5422_s24 + $0x130] sm:$0xf0]  ;;  %v3600_v14 = vor.u32 %v4704_v1, %v3599_v0  ;;  %v4732_v21 = vld [vmem:[%s5422_s24 + $0x1d4] sm:$0xf0] }
 0x131   : > { %1658 = vmatpush.bf16.msrb.mxu1 %v3676_v15  ;;  %v4709_v43 = vld [vmem:[%s5422_s24 + $0x124] sm:$0xf]  ;;  %v3753_v47 = vld [vmem:[%s5422_s24 + $0x230] sm:$0xf0]  ;;  %v3500_v50 = vor.u32 %v4677_v41, %v3497_v42  ;;  %v3728_v15 = vor.u32 %v4736_v4, %v3727_v2  ;;  %v3839_v22 = vld [vmem:[%s5422_s24 + $0x2c8] sm:$0xf] }
 0x132   : > { %1671 = vmatpush.bf16.msrb.mxu2 %v3804_v16  ;;  %v4741_v46 = vld [vmem:[%s5422_s24 + $0x224] sm:$0xf]  ;;  %v3881_v49 = vld [vmem:[%s5422_s24 + $0x330] sm:$0xf0]  ;;  %v3628_v53 = vor.u32 %v4709_v43, %v3625_v45  ;;  %v3856_v16 = vor.u32 %v4768_v8, %v3855_v5  ;;  %v4764_v23 = vld [vmem:[%s5422_s24 + $0x2d4] sm:$0xf0] }
 0x133   : > { %1684 = vmatpush.bf16.msrb.mxu3 %v3932_v20  ;;  %v4773_v48 = vld [vmem:[%s5422_s24 + $0x324] sm:$0xf]  ;;  %v3481_v52 = vld [vmem:[%s5422_s24 + $0x10] sm:$0xf0]  ;;  %v3756_v54 = vor.u32 %v4741_v46, %v3753_v47  ;;  %v3984_v20 = vor.u32 %v4800_v12, %v3983_v11  ;;  %v3967_v24 = vld [vmem:[%s5422_s24 + $0x3c8] sm:$0xf] }
 0x134   : > { %1646 = vmatpush.bf16.msrb.mxu0 %v3532_v26  ;;  %v4673_v51 = vld [vmem:[%s5422_s24 + $0x4] sm:$0xf]  ;;  %v3609_v56 = vld [vmem:[%s5422_s24 + $0x110] sm:$0xf0]  ;;  %v3884_v59 = vor.u32 %v4773_v48, %v3881_v49  ;;  %v4796_v25 = vld [vmem:[%s5422_s24 + $0x3d4] sm:$0xf0]  ;;  %v3584_v26 = vor.u32 %v4700_v18, %v3583_v17 }
 0x135   : > { %1659 = vmatpush.bf16.msrb.mxu1 %v3660_v27  ;;  %v4705_v55 = vld [vmem:[%s5422_s24 + $0x104] sm:$0xf]  ;;  %v3737_v60 = vld [vmem:[%s5422_s24 + $0x210] sm:$0xf0]  ;;  %v3484_v3 = vor.u32 %v4673_v51, %v3481_v52  ;;  %v3712_v27 = vor.u32 %v4732_v21, %v3711_v19  ;;  %v3567_v29 = vld [vmem:[%s5422_s24 + $0xa8] sm:$0xf] }
 0x136   : > { %1672 = vmatpush.bf16.msrb.mxu2 %v3788_v28  ;;  %v4737_v58 = vld [vmem:[%s5422_s24 + $0x204] sm:$0xf]  ;;  %v3865_v63 = vld [vmem:[%s5422_s24 + $0x310] sm:$0xf0]  ;;  %v3612_v9 = vor.u32 %v4705_v55, %v3609_v56  ;;  %v3840_v28 = vor.u32 %v4764_v23, %v3839_v22  ;;  %v4696_v30 = vld [vmem:[%s5422_s24 + $0xb4] sm:$0xf0] }
 0x137   : > { %1685 = vmatpush.bf16.msrb.mxu3 %v3916_v32  ;;  %v4769_v61 = vld [vmem:[%s5422_s24 + $0x304] sm:$0xf]  ;;  %v3740_v10 = vor.u32 %v4737_v58, %v3737_v60  ;;  %v3695_v31 = vld [vmem:[%s5422_s24 + $0x1a8] sm:$0xf]  ;;  %v3968_v32 = vor.u32 %v4796_v25, %v3967_v24  ;;  %v4728_v33 = vld [vmem:[%s5422_s24 + $0x1b4] sm:$0xf0] }
 0x138   : > { %1647 = vmatpush.bf16.msrb.mxu0 %v3516_v38  ;;  %v3868_v13 = vor.u32 %v4769_v61, %v3865_v63  ;;  %v3823_v34 = vld [vmem:[%s5422_s24 + $0x2a8] sm:$0xf]  ;;  %v4760_v35 = vld [vmem:[%s5422_s24 + $0x2b4] sm:$0xf0]  ;;  %v3568_v38 = vor.u32 %v4696_v30, %v3567_v29 }
 0x139   : > { %1660 = vmatpush.bf16.msrb.mxu1 %v3644_v39  ;;  %v3951_v36 = vld [vmem:[%s5422_s24 + $0x3a8] sm:$0xf]  ;;  %v4792_v37 = vld [vmem:[%s5422_s24 + $0x3b4] sm:$0xf0]  ;;  %v3696_v39 = vor.u32 %v4728_v33, %v3695_v31 }
 0x13a   : > { %1673 = vmatpush.bf16.msrb.mxu2 %v3772_v40  ;;  %v3824_v40 = vor.u32 %v4760_v35, %v3823_v34  ;;  %v3551_v41 = vld [vmem:[%s5422_s24 + $0x88] sm:$0xf]  ;;  %v4692_v42 = vld [vmem:[%s5422_s24 + $0x94] sm:$0xf0] }
 0x13b   : > { %1686 = vmatpush.bf16.msrb.mxu3 %v3900_v44  ;;  %v3679_v43 = vld [vmem:[%s5422_s24 + $0x188] sm:$0xf]  ;;  %v3952_v44 = vor.u32 %v4792_v37, %v3951_v36  ;;  %v4724_v45 = vld [vmem:[%s5422_s24 + $0x194] sm:$0xf0] }
 0x13c   : > { %1648 = vmatpush.bf16.msrb.mxu0 %v3500_v50  ;;  %v3807_v46 = vld [vmem:[%s5422_s24 + $0x288] sm:$0xf]  ;;  %v4756_v47 = vld [vmem:[%s5422_s24 + $0x294] sm:$0xf0]  ;;  %v3552_v50 = vor.u32 %v4692_v42, %v3551_v41  ;;  %v3680_v51 = vor.u32 %v4724_v45, %v3679_v43  ;;  %v3729_v42 = vld [vmem:[%s5422_s24 + $0x1f8] sm:$0xf0] }
 0x13d   : > { %1661 = vmatpush.bf16.msrb.mxu1 %v3628_v53  ;;  %v3935_v48 = vld [vmem:[%s5422_s24 + $0x388] sm:$0xf]  ;;  %v4788_v49 = vld [vmem:[%s5422_s24 + $0x394] sm:$0xf0]  ;;  %v3808_v52 = vor.u32 %v4756_v47, %v3807_v46  ;;  %v4766_v43 = vld [vmem:[%s5422_s24 + $0x2ec] sm:$0xf] }
 0x13e   : > { %1674 = vmatpush.bf16.msrb.mxu2 %v3756_v54  ;;  %v3535_v53 = vld [vmem:[%s5422_s24 + $0x68] sm:$0xf]  ;;  %v4688_v54 = vld [vmem:[%s5422_s24 + $0x74] sm:$0xf0]  ;;  %v3936_v56 = vor.u32 %v4788_v49, %v3935_v48  ;;  %v4798_v47 = vld [vmem:[%s5422_s24 + $0x3ec] sm:$0xf] }
 0x13f   : > { %1687 = vmatpush.bf16.msrb.mxu3 %v3884_v59  ;;  %v3663_v55 = vld [vmem:[%s5422_s24 + $0x168] sm:$0xf]  ;;  %v4720_v58 = vld [vmem:[%s5422_s24 + $0x174] sm:$0xf0]  ;;  %v3536_v0 = vor.u32 %v4688_v54, %v3535_v53  ;;  %v3985_v48 = vld [vmem:[%s5422_s24 + $0x3f8] sm:$0xf0] }
 0x140   : > { %1649 = vmatpush.bf16.msrb.mxu0 %v3484_v3  ;;  %v3791_v59 = vld [vmem:[%s5422_s24 + $0x268] sm:$0xf]  ;;  %v4752_v60 = vld [vmem:[%s5422_s24 + $0x274] sm:$0xf0]  ;;  %v3664_v1 = vor.u32 %v4720_v58, %v3663_v55  ;;  %v4698_v53 = vld [vmem:[%s5422_s24 + $0xcc] sm:$0xf] }
 0x141   : > { %1662 = vmatpush.bf16.msrb.mxu1 %v3612_v9  ;;  %v3919_v61 = vld [vmem:[%s5422_s24 + $0x368] sm:$0xf]  ;;  %v4784_v63 = vld [vmem:[%s5422_s24 + $0x374] sm:$0xf0]  ;;  %v3792_v2 = vor.u32 %v4752_v60, %v3791_v59  ;;  %v3585_v54 = vld [vmem:[%s5422_s24 + $0xd8] sm:$0xf0] }
 0x142   : > { %1675 = vmatpush.bf16.msrb.mxu2 %v3740_v10  ;;  %v3519_v3 = vld [vmem:[%s5422_s24 + $0x48] sm:$0xf]  ;;  %v4684_v4 = vld [vmem:[%s5422_s24 + $0x54] sm:$0xf0]  ;;  %v3920_v8 = vor.u32 %v4784_v63, %v3919_v61  ;;  %v4730_v55 = vld [vmem:[%s5422_s24 + $0x1cc] sm:$0xf] }
 0x143   : > { %1688 = vmatpush.bf16.msrb.mxu3 %v3868_v13  ;;  %1650 = vmatmul.bf16.vlgmr.msrb.gmra.mxu0 %v5548_v6  ;;  %v3647_v5 = vld [vmem:[%s5422_s24 + $0x148] sm:$0xf]  ;;  %v4716_v9 = vld [vmem:[%s5422_s24 + $0x154] sm:$0xf0]  ;;  %v3713_v58 = vld [vmem:[%s5422_s24 + $0x1d8] sm:$0xf0] }
 0x144   : > { %1694 = vmatpush.bf16.msra.mxu0 %v3600_v14  ;;  %1663 = vmatmul.bf16.vlgmr.msrb.gmra.mxu1 %v5550_v7  ;;  %v3775_v10 = vld [vmem:[%s5422_s24 + $0x248] sm:$0xf]  ;;  %v4748_v11 = vld [vmem:[%s5422_s24 + $0x254] sm:$0xf0]  ;;  %v3520_v14 = vor.u32 %v4684_v4, %v3519_v3  ;;  %v4762_v59 = vld [vmem:[%s5422_s24 + $0x2cc] sm:$0xf] }
 0x145   : > { %1707 = vmatpush.bf16.msra.mxu1 %v3728_v15  ;;  %1676 = vmatmul.bf16.vlgmr.msrb.gmra.mxu2 %v5538_v57  ;;  %v3903_v12 = vld [vmem:[%s5422_s24 + $0x348] sm:$0xf]  ;;  %v4780_v13 = vld [vmem:[%s5422_s24 + $0x354] sm:$0xf0]  ;;  %v3648_v15 = vor.u32 %v4716_v9, %v3647_v5  ;;  %v3841_v60 = vld [vmem:[%s5422_s24 + $0x2d8] sm:$0xf0] }
 0x146   : > { %1720 = vmatpush.bf16.msra.mxu2 %v3856_v16  ;;  %1689 = vmatmul.bf16.vlgmr.msrb.gmra.mxu3 %v5542_v62  ;;  %v3776_v16 = vor.u32 %v4748_v11, %v3775_v10  ;;  %v3503_v17 = vld [vmem:[%s5422_s24 + $0x28] sm:$0xf]  ;;  %v4680_v18 = vld [vmem:[%s5422_s24 + $0x34] sm:$0xf0]  ;;  %v4794_v61 = vld [vmem:[%s5422_s24 + $0x3cc] sm:$0xf] }
 0x147   : > { %1733 = vmatpush.bf16.msra.mxu3 %v3984_v20  ;;  %v3631_v19 = vld [vmem:[%s5422_s24 + $0x128] sm:$0xf]  ;;  %v3904_v20 = vor.u32 %v4780_v13, %v3903_v12  ;;  %v4712_v21 = vld [vmem:[%s5422_s24 + $0x134] sm:$0xf0]  ;;  %v3969_v63 = vld [vmem:[%s5422_s24 + $0x3d8] sm:$0xf0] }
 0x148   : > { %1695 = vmatpush.bf16.msra.mxu0 %v3584_v26  ;;  %v3759_v22 = vld [vmem:[%s5422_s24 + $0x228] sm:$0xf]  ;;  %v4744_v23 = vld [vmem:[%s5422_s24 + $0x234] sm:$0xf0]  ;;  %v3504_v26 = vor.u32 %v4680_v18, %v3503_v17  ;;  %v3632_v29 = vor.u32 %v4712_v21, %v3631_v19  ;;  %v4694_v3 = vld [vmem:[%s5422_s24 + $0xac] sm:$0xf] }
 0x149   : > { %1708 = vmatpush.bf16.msra.mxu1 %v3712_v27  ;;  %v3887_v24 = vld [vmem:[%s5422_s24 + $0x328] sm:$0xf]  ;;  %v4776_v25 = vld [vmem:[%s5422_s24 + $0x334] sm:$0xf0]  ;;  %v3760_v30 = vor.u32 %v4744_v23, %v3759_v22  ;;  %v3569_v4 = vld [vmem:[%s5422_s24 + $0xb8] sm:$0xf0] }
 0x14a   : > { %1721 = vmatpush.bf16.msra.mxu2 %v3840_v28  ;;  %v3487_v27 = vld [vmem:[%s5422_s24 + $0x8] sm:$0xf]  ;;  %v4676_v28 = vld [vmem:[%s5422_s24 + $0x14] sm:$0xf0]  ;;  %v3888_v34 = vor.u32 %v4776_v25, %v3887_v24  ;;  %v4726_v5 = vld [vmem:[%s5422_s24 + $0x1ac] sm:$0xf] }
 0x14b   : > { %1734 = vmatpush.bf16.msra.mxu3 %v3968_v32  ;;  %v3615_v31 = vld [vmem:[%s5422_s24 + $0x108] sm:$0xf]  ;;  %v4708_v32 = vld [vmem:[%s5422_s24 + $0x114] sm:$0xf0]  ;;  %v3488_v41 = vor.u32 %v4676_v28, %v3487_v27  ;;  %v3697_v9 = vld [vmem:[%s5422_s24 + $0x1b8] sm:$0xf0] }
 0x14c   : > { %1696 = vmatpush.bf16.msra.mxu0 %v3568_v38  ;;  %v3743_v33 = vld [vmem:[%s5422_s24 + $0x208] sm:$0xf]  ;;  %v4740_v35 = vld [vmem:[%s5422_s24 + $0x214] sm:$0xf0]  ;;  %v4702_v38 = vld [vmem:[%s5422_s24 + $0xec] sm:$0xf]  ;;  %v3616_v45 = vor.u32 %v4708_v32, %v3615_v31 }
 0x14d   : > { %1709 = vmatpush.bf16.msra.mxu1 %v3696_v39  ;;  %v3871_v36 = vld [vmem:[%s5422_s24 + $0x308] sm:$0xf]  ;;  %v4772_v37 = vld [vmem:[%s5422_s24 + $0x314] sm:$0xf0]  ;;  %v3601_v39 = vld [vmem:[%s5422_s24 + $0xf8] sm:$0xf0]  ;;  %v3744_v46 = vor.u32 %v4740_v35, %v3743_v33 }
 0x14e   : > { %1722 = vmatpush.bf16.msra.mxu2 %v3824_v40  ;;  %v4734_v40 = vld [vmem:[%s5422_s24 + $0x1ec] sm:$0xf]  ;;  %v3872_v49 = vor.u32 %v4772_v37, %v3871_v36  ;;  %v3825_v11 = vld [vmem:[%s5422_s24 + $0x2b8] sm:$0xf0] }
 0x14f   : > { %1735 = vmatpush.bf16.msra.mxu3 %v3952_v44  ;;  %v3857_v44 = vld [vmem:[%s5422_s24 + $0x2f8] sm:$0xf0]  ;;  %v4758_v10 = vld [vmem:[%s5422_s24 + $0x2ac] sm:$0xf] }
 0x150   : > { %1697 = vmatpush.bf16.msra.mxu0 %v3552_v50  ;;  %v3604_v50 = vor.u32 %v4702_v38, %v3601_v39  ;;  %v4790_v12 = vld [vmem:[%s5422_s24 + $0x3ac] sm:$0xf]  ;;  %v3953_v13 = vld [vmem:[%s5422_s24 + $0x3b8] sm:$0xf0] }
 0x151   : > { %1710 = vmatpush.bf16.msra.mxu1 %v3680_v51  ;;  %v3732_v51 = vor.u32 %v4734_v40, %v3729_v42  ;;  %v4690_v17 = vld [vmem:[%s5422_s24 + $0x8c] sm:$0xf]  ;;  %v3553_v18 = vld [vmem:[%s5422_s24 + $0x98] sm:$0xf0] }
 0x152   : > { %1723 = vmatpush.bf16.msra.mxu2 %v3808_v52  ;;  %v3860_v52 = vor.u32 %v4766_v43, %v3857_v44  ;;  %v4722_v19 = vld [vmem:[%s5422_s24 + $0x18c] sm:$0xf]  ;;  %v3681_v21 = vld [vmem:[%s5422_s24 + $0x198] sm:$0xf0] }
 0x153   : > { %1736 = vmatpush.bf16.msra.mxu3 %v3936_v56  ;;  %v3988_v56 = vor.u32 %v4798_v47, %v3985_v48  ;;  %v4754_v22 = vld [vmem:[%s5422_s24 + $0x28c] sm:$0xf]  ;;  %v3809_v23 = vld [vmem:[%s5422_s24 + $0x298] sm:$0xf0]  ;;  %v3684_v27 = vor.u32 %v4722_v19, %v3681_v21 }
 0x154   : > { %1698 = vmatpush.bf16.msra.mxu0 %v3536_v0  ;;  %v3588_v0 = vor.u32 %v4698_v53, %v3585_v54  ;;  %v4786_v24 = vld [vmem:[%s5422_s24 + $0x38c] sm:$0xf]  ;;  %v3937_v25 = vld [vmem:[%s5422_s24 + $0x398] sm:$0xf0]  ;;  %v3812_v28 = vor.u32 %v4754_v22, %v3809_v23 }
 0x155   : > { %1711 = vmatpush.bf16.msra.mxu1 %v3664_v1  ;;  %v3716_v1 = vor.u32 %v4730_v55, %v3713_v58  ;;  %v4718_v31 = vld [vmem:[%s5422_s24 + $0x16c] sm:$0xf]  ;;  %v3940_v32 = vor.u32 %v4786_v24, %v3937_v25  ;;  %v3665_v33 = vld [vmem:[%s5422_s24 + $0x178] sm:$0xf0]  ;;  %v796_v25 = vld [vmem:[%s5441_s21] sm:$0xf] }
 0x156   : > { %1724 = vmatpush.bf16.msra.mxu2 %v3792_v2  ;;  %v3844_v2 = vor.u32 %v4762_v59, %v3841_v60  ;;  %v3793_v35 = vld [vmem:[%s5422_s24 + $0x278] sm:$0xf0]  ;;  %v4782_v36 = vld [vmem:[%s5422_s24 + $0x36c] sm:$0xf]  ;;  %v3668_v39 = vor.u32 %v4718_v31, %v3665_v33 }
 0x157   : > { %1737 = vmatpush.bf16.msra.mxu3 %v3920_v8  ;;  %v3972_v8 = vor.u32 %v4794_v61, %v3969_v63  ;;  %v3921_v37 = vld [vmem:[%s5422_s24 + $0x378] sm:$0xf0]  ;;  %v4714_v43 = vld [vmem:[%s5422_s24 + $0x14c] sm:$0xf] }
 0x158   : > { %1699 = vmatpush.bf16.msra.mxu0 %v3520_v14  ;;  %v3572_v14 = vor.u32 %v4694_v3, %v3569_v4  ;;  %v3521_v42 = vld [vmem:[%s5422_s24 + $0x58] sm:$0xf0]  ;;  %v3924_v44 = vor.u32 %v4782_v36, %v3921_v37  ;;  %v4778_v48 = vld [vmem:[%s5422_s24 + $0x34c] sm:$0xf] }
 0x159   : > { %1712 = vmatpush.bf16.msra.mxu1 %v3648_v15  ;;  %v3700_v15 = vor.u32 %v4726_v5, %v3697_v9  ;;  %v3777_v47 = vld [vmem:[%s5422_s24 + $0x258] sm:$0xf0]  ;;  %v4678_v53 = vld [vmem:[%s5422_s24 + $0x2c] sm:$0xf] }
 0x15a   : > { %1725 = vmatpush.bf16.msra.mxu2 %v3776_v16  ;;  %v3828_v16 = vor.u32 %v4758_v10, %v3825_v11  ;;  %v3505_v54 = vld [vmem:[%s5422_s24 + $0x38] sm:$0xf0]  ;;  %v4710_v55 = vld [vmem:[%s5422_s24 + $0x12c] sm:$0xf] }
 0x15b   : > { %1738 = vmatpush.bf16.msra.mxu3 %v3904_v20  ;;  %v3956_v20 = vor.u32 %v4790_v12, %v3953_v13  ;;  %v3633_v58 = vld [vmem:[%s5422_s24 + $0x138] sm:$0xf0]  ;;  %v4742_v59 = vld [vmem:[%s5422_s24 + $0x22c] sm:$0xf] }
 0x15c   : > { %1700 = vmatpush.bf16.msra.mxu0 %v3504_v26  ;;  %v3556_v26 = vor.u32 %v4690_v17, %v3553_v18  ;;  %v3761_v60 = vld [vmem:[%s5422_s24 + $0x238] sm:$0xf0]  ;;  %v4774_v61 = vld [vmem:[%s5422_s24 + $0x32c] sm:$0xf] }
 0x15d   : > { %1713 = vmatpush.bf16.msra.mxu1 %v3632_v29  ;;  %v4686_v29 = vld [vmem:[%s5422_s24 + $0x6c] sm:$0xf]  ;;  %v3889_v63 = vld [vmem:[%s5422_s24 + $0x338] sm:$0xf0] }
 0x15e   : > { %1726 = vmatpush.bf16.msra.mxu2 %v3760_v30  ;;  %v3537_v30 = vld [vmem:[%s5422_s24 + $0x78] sm:$0xf0]  ;;  %v4674_v3 = vld [vmem:[%s5422_s24 + $0xc] sm:$0xf] }
 0x15f   : > { %1739 = vmatpush.bf16.msra.mxu3 %v3888_v34  ;;  %v4750_v34 = vld [vmem:[%s5422_s24 + $0x26c] sm:$0xf]  ;;  %v3540_v38 = vor.u32 %v4686_v29, %v3537_v30  ;;  %v3489_v4 = vld [vmem:[%s5422_s24 + $0x18] sm:$0xf0]  ;;  %v929_v29 = vperm.slane %v796_v25, 1 }
 0x160   : > { %1701 = vmatpush.bf16.msra.mxu0 %v3488_v41  ;;  %v3796_v40 = vor.u32 %v4750_v34, %v3793_v35  ;;  %v4682_v41 = vld [vmem:[%s5422_s24 + $0x4c] sm:$0xf]  ;;  %v3617_v9 = vld [vmem:[%s5422_s24 + $0x118] sm:$0xf0] }
 0x161   : > { %1714 = vmatpush.bf16.msra.mxu1 %v3616_v45  ;;  %v3649_v45 = vld [vmem:[%s5422_s24 + $0x158] sm:$0xf0]  ;;  %v4706_v5 = vld [vmem:[%s5422_s24 + $0x10c] sm:$0xf] }
 0x162   : > { %1727 = vmatpush.bf16.msra.mxu2 %v3744_v46  ;;  %v4746_v46 = vld [vmem:[%s5422_s24 + $0x24c] sm:$0xf]  ;;  %v3745_v11 = vld [vmem:[%s5422_s24 + $0x218] sm:$0xf0] }
 0x163   : > { %1740 = vmatpush.bf16.msra.mxu3 %v3872_v49  ;;  %1702 = vmatmul.bf16.vlgmr.msra.gmra.mxu0 %v5548_v6  ;;  %v3905_v49 = vld [vmem:[%s5422_s24 + $0x358] sm:$0xf0]  ;;  %v4738_v10 = vld [vmem:[%s5422_s24 + $0x20c] sm:$0xf] }
 0x164   : > { %1746 = vmatpush.bf16.msrb.mxu0 %v3604_v50  ;;  %1715 = vmatmul.bf16.vlgmr.msra.gmra.mxu1 %v5550_v7  ;;  %v3524_v50 = vor.u32 %v4682_v41, %v3521_v42  ;;  %v4770_v12 = vld [vmem:[%s5422_s24 + $0x30c] sm:$0xf]  ;;  %v3873_v13 = vld [vmem:[%s5422_s24 + $0x318] sm:$0xf0] }
 0x165   : > { %1759 = vmatpush.bf16.msrb.mxu1 %v3732_v51  ;;  %1728 = vmatmul.bf16.vlgmr.msra.gmra.mxu2 %v5538_v57  ;;  %v3652_v51 = vor.u32 %v4714_v43, %v3649_v45  ;;  %v3876_v17 = vor.u32 %v4770_v12, %v3873_v13 }
 0x166   : > { %1772 = vmatpush.bf16.msrb.mxu2 %v3860_v52  ;;  %1741 = vmatmul.bf16.vlgmr.msra.gmra.mxu3 %v5542_v62  ;;  %v3780_v52 = vor.u32 %v4746_v46, %v3777_v47 }
 0x167   : > { %1785 = vmatpush.bf16.msrb.mxu3 %v3988_v56  ;;  %v3908_v56 = vor.u32 %v4778_v48, %v3905_v49 }
 0x168   : > { %1747 = vmatpush.bf16.msrb.mxu0 %v3588_v0  ;;  %v3508_v0 = vor.u32 %v4678_v53, %v3505_v54  ;;  %v931_v54 = vperm.slane %v796_v25, 3 }
 0x169   : > { %1760 = vmatpush.bf16.msrb.mxu1 %v3716_v1  ;;  %v3636_v1 = vor.u32 %v4710_v55, %v3633_v58 }
 0x16a   : > { %1773 = vmatpush.bf16.msrb.mxu2 %v3844_v2  ;;  %v3764_v2 = vor.u32 %v4742_v59, %v3761_v60 }
 0x16b   : > { %1786 = vmatpush.bf16.msrb.mxu3 %v3972_v8  ;;  %v3892_v8 = vor.u32 %v4774_v61, %v3889_v63 }
 0x16c   : > { %1748 = vmatpush.bf16.msrb.mxu0 %v3572_v14  ;;  %v3492_v14 = vor.u32 %v4674_v3, %v3489_v4 }
 0x16d   : > { %1761 = vmatpush.bf16.msrb.mxu1 %v3700_v15  ;;  %v3620_v15 = vor.u32 %v4706_v5, %v3617_v9 }
 0x16e   : > { %1774 = vmatpush.bf16.msrb.mxu2 %v3828_v16  ;;  %v3748_v16 = vor.u32 %v4738_v10, %v3745_v11 }
 0x16f   : > { %1787 = vmatpush.bf16.msrb.mxu3 %v3956_v20 }
 0x170   : > { %1749 = vmatpush.bf16.msrb.mxu0 %v3556_v26 }
 0x171   : > { %1762 = vmatpush.bf16.msrb.mxu1 %v3684_v27  ;;  %v928_v27 = vperm.slane %v796_v25, 0 }
 0x172   : > { %1775 = vmatpush.bf16.msrb.mxu2 %v3812_v28 }
 0x173   : > { %1788 = vmatpush.bf16.msrb.mxu3 %v3940_v32 }
 0x174   : > { %1750 = vmatpush.bf16.msrb.mxu0 %v3540_v38 }
 0x175   : > { %1763 = vmatpush.bf16.msrb.mxu1 %v3668_v39 }
 0x176   : > { %1776 = vmatpush.bf16.msrb.mxu2 %v3796_v40 }
 0x177   : > { %1789 = vmatpush.bf16.msrb.mxu3 %v3924_v44 }
 0x178   : > { %1751 = vmatpush.bf16.msrb.mxu0 %v3524_v50 }
 0x179   : > { %1764 = vmatpush.bf16.msrb.mxu1 %v3652_v51 }
 0x17a   : > { %1777 = vmatpush.bf16.msrb.mxu2 %v3780_v52  ;;  %v930_v52 = vperm.slane %v796_v25, 2 }
 0x17b   : > { %1790 = vmatpush.bf16.msrb.mxu3 %v3908_v56 }
 0x17c   : > { %1752 = vmatpush.bf16.msrb.mxu0 %v3508_v0 }
 0x17d   : > { %1765 = vmatpush.bf16.msrb.mxu1 %v3636_v1 }
 0x17e   : > { %1778 = vmatpush.bf16.msrb.mxu2 %v3764_v2 }
 0x17f   : > { %1791 = vmatpush.bf16.msrb.mxu3 %v3892_v8 }
 0x180   : > { %1753 = vmatpush.bf16.msrb.mxu0 %v3492_v14 }
 0x181   : > { %1766 = vmatpush.bf16.msrb.mxu1 %v3620_v15 }
 0x182   : > { %1779 = vmatpush.bf16.msrb.mxu2 %v3748_v16 }
 0x183   : > { %1792 = vmatpush.bf16.msrb.mxu3 %v3876_v17  ;;  %1754 = vmatmul.bf16.vlgmr.msrb.gmra.mxu0 %v5548_v6 }
 0x184   : > { %1767 = vmatmul.bf16.vlgmr.msrb.gmra.mxu1 %v5550_v7 }
 0x185   : > { %1780 = vmatmul.bf16.vlgmr.msrb.gmra.mxu2 %v5538_v57 }
 0x186   : > { %1793 = vmatmul.bf16.vlgmr.msrb.gmra.mxu3 %v5542_v62 }
 0x1a4   : > { %v1599_v18 = vpop.f32.mrf.mxu0 }
 0x1a5   : > { %v1612_v19 = vpop.f32.mrf.mxu1  ;;  %v1600_v28 = vadd.f32 %v1599_v18, %v928_v27 }
 0x1a7   : > { %v1613_v6 = vadd.f32 %v1612_v19, %v1600_v28 }
 0x1a8   : > { %v1625_v20 = vpop.f32.mrf.mxu2 }
 0x1a9   : > { %v1638_v21 = vpop.f32.mrf.mxu3  ;;  %v1626_v57 = vadd.f32 %v1625_v20, %v1613_v6 }
 0x1ab   : > { %v1639_v33 = vadd.f32 %v1638_v21, %v1626_v57 }
 0x1ac   : > { %v1601_v22 = vpop.f32.mrf.mxu0 }
 0x1ad   : > { %v1614_v23 = vpop.f32.mrf.mxu1  ;;  %v1798_v39 = vmax.f32 %v1639_v33, 0.0 }
 0x1b0   : > { %v1627_v24 = vpop.f32.mrf.mxu2 }
 0x1b1   : > { %v1640_v26 = vpop.f32.mrf.mxu3 }
 0x1c0   : > { %v1651_v30 = vpop.f32.mrf.mxu0 }
 0x1c1   : > { %v1652_v7 = vadd.f32 %v1651_v30, %v929_v29  ;;  %v1664_v31 = vpop.f32.mrf.mxu1 }
 0x1c3   : > { %v1665_v32 = vadd.f32 %v1664_v31, %v1652_v7 }
 0x1c8   : > { %v1677_v62 = vpop.f32.mrf.mxu2  ;;  %v1653_v37 = vpop.f32.mrf.mxu0 }
 0x1c9   : > { %v1678_v34 = vadd.f32 %v1677_v62, %v1665_v32  ;;  %v1690_v35 = vpop.f32.mrf.mxu3  ;;  %v1666_v38 = vpop.f32.mrf.mxu1 }
 0x1cb   : > { %v1691_v36 = vadd.f32 %v1690_v35, %v1678_v34 }
 0x1cd   : > { %v1799_v40 = vmax.f32 %v1691_v36, 0.0 }
 0x1cf   : > { %v1802_v41 = vpack.c.bf16 %v1799_v40, %v1798_v39 }
 0x1d0   : > { %v1679_v42 = vpop.f32.mrf.mxu2 }
 0x1d1   : > { %1807 = vst [vmem:[%s5734_s27] sm:$0xff] %v1802_v41  ;;  %v1692_v43 = vpop.f32.mrf.mxu3 }
 0x1e0   : > { %v1703_v44 = vpop.f32.mrf.mxu0 }
 0x1e1   : > { %v1716_v45 = vpop.f32.mrf.mxu1  ;;  %v1704_v53 = vadd.f32 %v1703_v44, %v930_v52 }
 0x1e3   : > { %v1717_v55 = vadd.f32 %v1716_v45, %v1704_v53 }
 0x1e8   : > { %v1729_v46 = vpop.f32.mrf.mxu2  ;;  %v1705_v48 = vpop.f32.mrf.mxu0 }
 0x1e9   : > { %v1742_v47 = vpop.f32.mrf.mxu3  ;;  %v1718_v49 = vpop.f32.mrf.mxu1  ;;  %v1730_v60 = vadd.f32 %v1729_v46, %v1717_v55 }
 0x1eb   : > { %v1743_v0 = vadd.f32 %v1742_v47, %v1730_v60 }
 0x1ed   : > { %v1800_v8 = vmax.f32 %v1743_v0, 0.0 }
 0x1f0   : > { %v1731_v50 = vpop.f32.mrf.mxu2 }
 0x1f1   : > { %v1744_v51 = vpop.f32.mrf.mxu3 }
 0x200   : > { %v1755_v56 = vpop.f32.mrf.mxu0 }
 0x201   : > { %v1756_v58 = vadd.f32 %v1755_v56, %v931_v54  ;;  %v1768_v59 = vpop.f32.mrf.mxu1 }
 0x203   : > { %v1769_v61 = vadd.f32 %v1768_v59, %v1756_v58 }
 0x208   : > { %v1781_v63 = vpop.f32.mrf.mxu2  ;;  %v1757_v3 = vpop.f32.mrf.mxu0 }
 0x209   : > { %v1782_v1 = vadd.f32 %v1781_v63, %v1769_v61  ;;  %v1794_v2 = vpop.f32.mrf.mxu3  ;;  %v1770_v4 = vpop.f32.mrf.mxu1 }
 0x20b   : > { %v1795_v5 = vadd.f32 %v1794_v2, %v1782_v1 }
 0x20d   : > { %v1801_v9 = vmax.f32 %v1795_v5, 0.0 }
 0x20f   : > { %v1803_v10 = vpack.c.bf16 %v1801_v9, %v1800_v8 }
 0x210   : > { %v1783_v11 = vpop.f32.mrf.mxu2 }
 0x211   : > { %1808 = vst [vmem:[%s5734_s27 + $0x8] sm:$0xff] %v1803_v10  ;;  %v1796_v12 = vpop.f32.mrf.mxu3 }
 0x212 PF: > { %p3991_p0 = scmp.lt.s32.totalorder %s5358_s15, 1 }
 0x213   : > { %s4504_s1 = sadd.s32 (!%p3991_p0), 4294967295, %s5358_s15 }
 0x214   : > { %1812 = sbr.rel (%p3991_p0) target bundleno = 810 (0x32a), region = 84  ;;  %s5767_s23 = sshll.u32 (!%p3991_p0), %s4504_s1, 4 }
 0x215   : > { %s2824_s12 = scalar_lea.vmem (!%p3991_p0), [#allocation2], %s5767_s23 }
 0x219   : > { %v4106_v13 = vld [vmem:[#allocation9 + $0xe0] sm:$0xf]  ;;  %v4832_v14 = vld [vmem:[#allocation9 + $0xec] sm:$0xf0] }
 0x21a   : > { %v4234_v15 = vld [vmem:[#allocation9 + $0x1e0] sm:$0xf]  ;;  %v4107_v16 = vor.u32 %v4832_v14, %v4106_v13  ;;  %v4864_v17 = vld [vmem:[#allocation9 + $0x1ec] sm:$0xf0] }
 0x21b   : > { %v4362_v18 = vld [vmem:[#allocation9 + $0x2e0] sm:$0xf]  ;;  %v4896_v19 = vld [vmem:[#allocation9 + $0x2ec] sm:$0xf0]  ;;  %v4235_v20 = vor.u32 %v4864_v17, %v4234_v15 }
 0x21c   : > { %v4363_v21 = vor.u32 %v4896_v19, %v4362_v18  ;;  %v4490_v22 = vld [vmem:[#allocation9 + $0x3e0] sm:$0xf]  ;;  %v4928_v23 = vld [vmem:[#allocation9 + $0x3ec] sm:$0xf0]  ;;  %2607 = vmatpush.bf16.msra.mxu0 %v4107_v16 }
 0x21d   : > { %v4090_v24 = vld [vmem:[#allocation9 + $0xc0] sm:$0xf]  ;;  %v4491_v25 = vor.u32 %v4928_v23, %v4490_v22  ;;  %v4828_v26 = vld [vmem:[#allocation9 + $0xcc] sm:$0xf0]  ;;  %2620 = vmatpush.bf16.msra.mxu1 %v4235_v20 }
 0x21e   : > { %v4218_v27 = vld [vmem:[#allocation9 + $0x1c0] sm:$0xf]  ;;  %v4860_v28 = vld [vmem:[#allocation9 + $0x1cc] sm:$0xf0]  ;;  %2633 = vmatpush.bf16.msra.mxu2 %v4363_v21  ;;  %v4091_v29 = vor.u32 %v4828_v26, %v4090_v24 }
 0x21f   : > { %v4219_v6 = vor.u32 %v4860_v28, %v4218_v27  ;;  %v4346_v30 = vld [vmem:[#allocation9 + $0x2c0] sm:$0xf]  ;;  %v4892_v7 = vld [vmem:[#allocation9 + $0x2cc] sm:$0xf0]  ;;  %2646 = vmatpush.bf16.msra.mxu3 %v4491_v25 }
 0x220   : > { %v4474_v31 = vld [vmem:[#allocation9 + $0x3c0] sm:$0xf]  ;;  %v4347_v57 = vor.u32 %v4892_v7, %v4346_v30  ;;  %v4924_v32 = vld [vmem:[#allocation9 + $0x3cc] sm:$0xf0]  ;;  %2608 = vmatpush.bf16.msra.mxu0 %v4091_v29 }
 0x221   : > { %v4074_v62 = vld [vmem:[#allocation9 + $0xa0] sm:$0xf]  ;;  %v4824_v33 = vld [vmem:[#allocation9 + $0xac] sm:$0xf0]  ;;  %v4475_v34 = vor.u32 %v4924_v32, %v4474_v31  ;;  %2621 = vmatpush.bf16.msra.mxu1 %v4219_v6 }
 0x222   : > { %v4202_v35 = vld [vmem:[#allocation9 + $0x1a0] sm:$0xf]  ;;  %v4856_v36 = vld [vmem:[#allocation9 + $0x1ac] sm:$0xf0]  ;;  %v4075_v38 = vor.u32 %v4824_v33, %v4074_v62  ;;  %2634 = vmatpush.bf16.msra.mxu2 %v4347_v57 }
 0x223   : > { %v4330_v37 = vld [vmem:[#allocation9 + $0x2a0] sm:$0xf]  ;;  %v4888_v39 = vld [vmem:[#allocation9 + $0x2ac] sm:$0xf0]  ;;  %v4203_v42 = vor.u32 %v4856_v36, %v4202_v35  ;;  %2647 = vmatpush.bf16.msra.mxu3 %v4475_v34 }
 0x224   : > { %v4458_v40 = vld [vmem:[#allocation9 + $0x3a0] sm:$0xf]  ;;  %v4920_v41 = vld [vmem:[#allocation9 + $0x3ac] sm:$0xf0]  ;;  %v4331_v43 = vor.u32 %v4888_v39, %v4330_v37  ;;  %2609 = vmatpush.bf16.msra.mxu0 %v4075_v38  ;;  %v4830_v37 = vld [vmem:[#allocation9 + $0xe4] sm:$0xf] }
 0x225   : > { %v4058_v44 = vld [vmem:[#allocation9 + $0x80] sm:$0xf]  ;;  %v4820_v45 = vld [vmem:[#allocation9 + $0x8c] sm:$0xf0]  ;;  %v4459_v47 = vor.u32 %v4920_v41, %v4458_v40  ;;  %2622 = vmatpush.bf16.msra.mxu1 %v4203_v42  ;;  %v4108_v38 = vld [vmem:[#allocation9 + $0xf0] sm:$0xf0] }
 0x226   : > { %v4186_v46 = vld [vmem:[#allocation9 + $0x180] sm:$0xf]  ;;  %v4852_v48 = vld [vmem:[#allocation9 + $0x18c] sm:$0xf0]  ;;  %v4059_v53 = vor.u32 %v4820_v45, %v4058_v44  ;;  %2635 = vmatpush.bf16.msra.mxu2 %v4331_v43  ;;  %v4862_v39 = vld [vmem:[#allocation9 + $0x1e4] sm:$0xf] }
 0x227   : > { %v4314_v49 = vld [vmem:[#allocation9 + $0x280] sm:$0xf]  ;;  %v4884_v50 = vld [vmem:[#allocation9 + $0x28c] sm:$0xf0]  ;;  %v4187_v54 = vor.u32 %v4852_v48, %v4186_v46  ;;  %2648 = vmatpush.bf16.msra.mxu3 %v4459_v47  ;;  %v4236_v41 = vld [vmem:[#allocation9 + $0x1f0] sm:$0xf0] }
 0x228   : > { %v4442_v51 = vld [vmem:[#allocation9 + $0x380] sm:$0xf]  ;;  %v4916_v52 = vld [vmem:[#allocation9 + $0x38c] sm:$0xf0]  ;;  %v4315_v55 = vor.u32 %v4884_v50, %v4314_v49  ;;  %2610 = vmatpush.bf16.msra.mxu0 %v4059_v53  ;;  %v4894_v42 = vld [vmem:[#allocation9 + $0x2e4] sm:$0xf]  ;;  %v4111_v49 = vor.u32 %v4830_v37, %v4108_v38  ;;  %v4239_v50 = vor.u32 %v4862_v39, %v4236_v41 }
 0x229   : > { %v4042_v56 = vld [vmem:[#allocation9 + $0x60] sm:$0xf]  ;;  %v4816_v58 = vld [vmem:[#allocation9 + $0x6c] sm:$0xf0]  ;;  %v4443_v60 = vor.u32 %v4916_v52, %v4442_v51  ;;  %2623 = vmatpush.bf16.msra.mxu1 %v4187_v54  ;;  %v4364_v43 = vld [vmem:[#allocation9 + $0x2f0] sm:$0xf0] }
 0x22a   : > { %v4170_v59 = vld [vmem:[#allocation9 + $0x160] sm:$0xf]  ;;  %v4848_v61 = vld [vmem:[#allocation9 + $0x16c] sm:$0xf0]  ;;  %v4043_v3 = vor.u32 %v4816_v58, %v4042_v56  ;;  %2636 = vmatpush.bf16.msra.mxu2 %v4315_v55  ;;  %v4926_v46 = vld [vmem:[#allocation9 + $0x3e4] sm:$0xf]  ;;  %v4367_v51 = vor.u32 %v4894_v42, %v4364_v43 }
 0x22b   : > { %v4298_v63 = vld [vmem:[#allocation9 + $0x260] sm:$0xf]  ;;  %v4880_v0 = vld [vmem:[#allocation9 + $0x26c] sm:$0xf0]  ;;  %v4171_v4 = vor.u32 %v4848_v61, %v4170_v59  ;;  %2649 = vmatpush.bf16.msra.mxu3 %v4443_v60  ;;  %v4492_v47 = vld [vmem:[#allocation9 + $0x3f0] sm:$0xf0] }
 0x22c   : > { %v4426_v1 = vld [vmem:[#allocation9 + $0x360] sm:$0xf]  ;;  %v4912_v2 = vld [vmem:[#allocation9 + $0x36c] sm:$0xf0]  ;;  %v4299_v5 = vor.u32 %v4880_v0, %v4298_v63  ;;  %2611 = vmatpush.bf16.msra.mxu0 %v4043_v3  ;;  %v4826_v52 = vld [vmem:[#allocation9 + $0xc4] sm:$0xf]  ;;  %v4495_v55 = vor.u32 %v4926_v46, %v4492_v47 }
 0x22d   : > { %v4026_v8 = vld [vmem:[#allocation9 + $0x40] sm:$0xf]  ;;  %v4812_v9 = vld [vmem:[#allocation9 + $0x4c] sm:$0xf0]  ;;  %v4427_v11 = vor.u32 %v4912_v2, %v4426_v1  ;;  %2624 = vmatpush.bf16.msra.mxu1 %v4171_v4  ;;  %v4092_v53 = vld [vmem:[#allocation9 + $0xd0] sm:$0xf0] }
 0x22e   : > { %v4154_v10 = vld [vmem:[#allocation9 + $0x140] sm:$0xf]  ;;  %v4844_v12 = vld [vmem:[#allocation9 + $0x14c] sm:$0xf0]  ;;  %v4027_v17 = vor.u32 %v4812_v9, %v4026_v8  ;;  %2637 = vmatpush.bf16.msra.mxu2 %v4299_v5  ;;  %v4858_v54 = vld [vmem:[#allocation9 + $0x1c4] sm:$0xf]  ;;  %v4095_v0 = vor.u32 %v4826_v52, %v4092_v53 }
 0x22f   : > { %v4282_v13 = vld [vmem:[#allocation9 + $0x240] sm:$0xf]  ;;  %v4876_v14 = vld [vmem:[#allocation9 + $0x24c] sm:$0xf0]  ;;  %v4155_v18 = vor.u32 %v4844_v12, %v4154_v10  ;;  %2650 = vmatpush.bf16.msra.mxu3 %v4427_v11  ;;  %v4220_v56 = vld [vmem:[#allocation9 + $0x1d0] sm:$0xf0] }
 0x230   : > { %v4410_v15 = vld [vmem:[#allocation9 + $0x340] sm:$0xf]  ;;  %v4908_v16 = vld [vmem:[#allocation9 + $0x34c] sm:$0xf0]  ;;  %v4283_v19 = vor.u32 %v4876_v14, %v4282_v13  ;;  %2612 = vmatpush.bf16.msra.mxu0 %v4027_v17  ;;  %v4890_v58 = vld [vmem:[#allocation9 + $0x2c4] sm:$0xf]  ;;  %v4223_v4 = vor.u32 %v4858_v54, %v4220_v56 }
 0x231   : > { %v4010_v20 = vld [vmem:[#allocation9 + $0x20] sm:$0xf]  ;;  %v4808_v21 = vld [vmem:[#allocation9 + $0x2c] sm:$0xf0]  ;;  %v4411_v23 = vor.u32 %v4908_v16, %v4410_v15  ;;  %2625 = vmatpush.bf16.msra.mxu1 %v4155_v18  ;;  %v4348_v59 = vld [vmem:[#allocation9 + $0x2d0] sm:$0xf0] }
 0x232   : > { %v4138_v22 = vld [vmem:[#allocation9 + $0x120] sm:$0xf]  ;;  %v4840_v24 = vld [vmem:[#allocation9 + $0x12c] sm:$0xf0]  ;;  %v4011_v29 = vor.u32 %v4808_v21, %v4010_v20  ;;  %2638 = vmatpush.bf16.msra.mxu2 %v4283_v19  ;;  %v4922_v60 = vld [vmem:[#allocation9 + $0x3c4] sm:$0xf]  ;;  %v4351_v5 = vor.u32 %v4890_v58, %v4348_v59 }
 0x233   : > { %v4266_v25 = vld [vmem:[#allocation9 + $0x220] sm:$0xf]  ;;  %v4872_v26 = vld [vmem:[#allocation9 + $0x22c] sm:$0xf0]  ;;  %v4139_v7 = vor.u32 %v4840_v24, %v4138_v22  ;;  %2651 = vmatpush.bf16.msra.mxu3 %v4411_v23  ;;  %v4476_v61 = vld [vmem:[#allocation9 + $0x3d0] sm:$0xf0] }
 0x234   : > { %v4394_v27 = vld [vmem:[#allocation9 + $0x320] sm:$0xf]  ;;  %v4904_v28 = vld [vmem:[#allocation9 + $0x32c] sm:$0xf0]  ;;  %v4267_v31 = vor.u32 %v4872_v26, %v4266_v25  ;;  %2613 = vmatpush.bf16.msra.mxu0 %v4011_v29  ;;  %v1815_v63 = vld [vmem:[#allocation3 + $0x8] sm:$0xff]  ;;  %v4479_v11 = vor.u32 %v4922_v60, %v4476_v61 }
 0x235   : > { %v3994_v6 = vld [vmem:[#allocation9] sm:$0xf]  ;;  %v4804_v30 = vld [vmem:[#allocation9 + $0xc] sm:$0xf0]  ;;  %v4395_v33 = vor.u32 %v4904_v28, %v4394_v27  ;;  %2626 = vmatpush.bf16.msra.mxu1 %v4139_v7  ;;  %v4822_v1 = vld [vmem:[#allocation9 + $0xa4] sm:$0xf]  ;;  %v1957_v2 = vunpack.c.l.b16 %v1815_v63  ;;  %v1958_v3 = vunpack.c.h.b16 %v1815_v63 }
 0x236   : > { %v4122_v57 = vld [vmem:[#allocation9 + $0x100] sm:$0xf]  ;;  %v4836_v32 = vld [vmem:[#allocation9 + $0x10c] sm:$0xf0]  ;;  %v3995_v40 = vor.u32 %v4804_v30, %v3994_v6  ;;  %2639 = vmatpush.bf16.msra.mxu2 %v4267_v31  ;;  %v4076_v8 = vld [vmem:[#allocation9 + $0xb0] sm:$0xf0] }
 0x237   : > { %v4250_v62 = vld [vmem:[#allocation9 + $0x200] sm:$0xf]  ;;  %v4868_v34 = vld [vmem:[#allocation9 + $0x20c] sm:$0xf0]  ;;  %v4123_v44 = vor.u32 %v4836_v32, %v4122_v57  ;;  %2652 = vmatpush.bf16.msra.mxu3 %v4395_v33  ;;  %v4854_v9 = vld [vmem:[#allocation9 + $0x1a4] sm:$0xf]  ;;  %v5739_v14 = vpack.c.b16 %v1957_v2, %v1957_v2  ;;  %v5741_v19 = vpack.c.b16 %v1958_v3, %v1958_v3  ;;  %v4079_v21 = vor.u32 %v4822_v1, %v4076_v8 }
 0x238   : > { %v4378_v35 = vld [vmem:[#allocation9 + $0x300] sm:$0xf]  ;;  %v4900_v36 = vld [vmem:[#allocation9 + $0x30c] sm:$0xf0]  ;;  %v4251_v45 = vor.u32 %v4868_v34, %v4250_v62  ;;  %2614 = vmatpush.bf16.msra.mxu0 %v3995_v40  ;;  %v4204_v10 = vld [vmem:[#allocation9 + $0x1b0] sm:$0xf0] }
 0x239   : > { %v4379_v48 = vor.u32 %v4900_v36, %v4378_v35  ;;  %2627 = vmatpush.bf16.msra.mxu1 %v4123_v44  ;;  %v4886_v12 = vld [vmem:[#allocation9 + $0x2a4] sm:$0xf]  ;;  %v4332_v13 = vld [vmem:[#allocation9 + $0x2b0] sm:$0xf0]  ;;  %v4207_v22 = vor.u32 %v4854_v9, %v4204_v10 }
 0x23a   : > { %2640 = vmatpush.bf16.msra.mxu2 %v4251_v45  ;;  %v1814_v15 = vld [vmem:[#allocation3] sm:$0xff]  ;;  %v4918_v16 = vld [vmem:[#allocation9 + $0x3a4] sm:$0xf]  ;;  %v4335_v23 = vor.u32 %v4886_v12, %v4332_v13 }
 0x23b   : > { %2653 = vmatpush.bf16.msra.mxu3 %v4379_v48  ;;  %v4460_v17 = vld [vmem:[#allocation9 + $0x3b0] sm:$0xf0]  ;;  %v1955_v18 = vunpack.c.l.b16 %v1814_v15  ;;  %v1956_v20 = vunpack.c.h.b16 %v1814_v15  ;;  %v4818_v24 = vld [vmem:[#allocation9 + $0x84] sm:$0xf] }
 0x23c   : > { %2659 = vmatpush.bf16.msrb.mxu0 %v4111_v49  ;;  %v4060_v25 = vld [vmem:[#allocation9 + $0x90] sm:$0xf0]  ;;  %v4850_v26 = vld [vmem:[#allocation9 + $0x184] sm:$0xf]  ;;  %v4463_v29 = vor.u32 %v4918_v16, %v4460_v17 }
 0x23d   : > { %2672 = vmatpush.bf16.msrb.mxu1 %v4239_v50  ;;  %2641 = vmatmul.bf16.vlgmr.msra.gmra.mxu2 %v5739_v14  ;;  %v5744_v27 = vpack.c.b16 %v1955_v18, %v1955_v18  ;;  %v5746_v28 = vpack.c.b16 %v1956_v20, %v1956_v20  ;;  %v4188_v6 = vld [vmem:[#allocation9 + $0x190] sm:$0xf0]  ;;  %v4882_v30 = vld [vmem:[#allocation9 + $0x284] sm:$0xf]  ;;  %v4063_v32 = vor.u32 %v4818_v24, %v4060_v25  ;;  %v4865_v25 = vld [vmem:[#allocation9 + $0x1f4] sm:$0xf0] }
 0x23e   : > { %2685 = vmatpush.bf16.msrb.mxu2 %v4367_v51  ;;  %v4316_v7 = vld [vmem:[#allocation9 + $0x290] sm:$0xf0]  ;;  %v4914_v31 = vld [vmem:[#allocation9 + $0x384] sm:$0xf]  ;;  %2654 = vmatmul.bf16.vlgmr.msra.gmra.mxu3 %v5741_v19  ;;  %v4191_v62 = vor.u32 %v4850_v26, %v4188_v6  ;;  %v4370_v26 = vld [vmem:[#allocation9 + $0x2e8] sm:$0xf] }
 0x23f   : > { %2698 = vmatpush.bf16.msrb.mxu3 %v4495_v55  ;;  %v4444_v57 = vld [vmem:[#allocation9 + $0x390] sm:$0xf0]  ;;  %2615 = vmatmul.bf16.vlgmr.msra.gmra.mxu0 %v5744_v27  ;;  %v4319_v33 = vor.u32 %v4882_v30, %v4316_v7  ;;  %v4814_v34 = vld [vmem:[#allocation9 + $0x64] sm:$0xf]  ;;  %v4498_v7 = vld [vmem:[#allocation9 + $0x3e8] sm:$0xf] }
 0x240   : > { %2660 = vmatpush.bf16.msrb.mxu0 %v4095_v0  ;;  %2628 = vmatmul.bf16.vlgmr.msra.gmra.mxu1 %v5746_v28  ;;  %v4044_v35 = vld [vmem:[#allocation9 + $0x70] sm:$0xf0]  ;;  %v4846_v36 = vld [vmem:[#allocation9 + $0x164] sm:$0xf]  ;;  %v4447_v37 = vor.u32 %v4914_v31, %v4444_v57  ;;  %v4929_v31 = vld [vmem:[#allocation9 + $0x3f4] sm:$0xf0] }
 0x241   : > { %2673 = vmatpush.bf16.msrb.mxu1 %v4223_v4  ;;  %v4172_v38 = vld [vmem:[#allocation9 + $0x170] sm:$0xf0]  ;;  %v4878_v39 = vld [vmem:[#allocation9 + $0x264] sm:$0xf]  ;;  %v4047_v43 = vor.u32 %v4814_v34, %v4044_v35  ;;  %v4098_v34 = vld [vmem:[#allocation9 + $0xc8] sm:$0xf] }
 0x242   : > { %2686 = vmatpush.bf16.msrb.mxu2 %v4351_v5  ;;  %v4300_v40 = vld [vmem:[#allocation9 + $0x270] sm:$0xf0]  ;;  %v4910_v41 = vld [vmem:[#allocation9 + $0x364] sm:$0xf]  ;;  %v4175_v44 = vor.u32 %v4846_v36, %v4172_v38  ;;  %v4829_v35 = vld [vmem:[#allocation9 + $0xd4] sm:$0xf0] }
 0x243   : > { %2699 = vmatpush.bf16.msrb.mxu3 %v4479_v11  ;;  %v4428_v42 = vld [vmem:[#allocation9 + $0x370] sm:$0xf0]  ;;  %v4303_v45 = vor.u32 %v4878_v39, %v4300_v40  ;;  %v4810_v46 = vld [vmem:[#allocation9 + $0x44] sm:$0xf]  ;;  %v4226_v36 = vld [vmem:[#allocation9 + $0x1c8] sm:$0xf] }
 0x244   : > { %2661 = vmatpush.bf16.msrb.mxu0 %v4079_v21  ;;  %v4028_v47 = vld [vmem:[#allocation9 + $0x50] sm:$0xf0]  ;;  %v4842_v48 = vld [vmem:[#allocation9 + $0x144] sm:$0xf]  ;;  %v4431_v49 = vor.u32 %v4910_v41, %v4428_v42  ;;  %v4114_v21 = vld [vmem:[#allocation9 + $0xe8] sm:$0xf] }
 0x245   : > { %2674 = vmatpush.bf16.msrb.mxu1 %v4207_v22  ;;  %v4156_v50 = vld [vmem:[#allocation9 + $0x150] sm:$0xf0]  ;;  %v4874_v51 = vld [vmem:[#allocation9 + $0x244] sm:$0xf]  ;;  %v4031_v55 = vor.u32 %v4810_v46, %v4028_v47  ;;  %v4833_v22 = vld [vmem:[#allocation9 + $0xf4] sm:$0xf0] }
 0x246   : > { %2687 = vmatpush.bf16.msrb.mxu2 %v4335_v23  ;;  %v4284_v52 = vld [vmem:[#allocation9 + $0x250] sm:$0xf0]  ;;  %v4906_v53 = vld [vmem:[#allocation9 + $0x344] sm:$0xf]  ;;  %v4159_v56 = vor.u32 %v4842_v48, %v4156_v50  ;;  %v4242_v23 = vld [vmem:[#allocation9 + $0x1e8] sm:$0xf] }
 0x247   : > { %2700 = vmatpush.bf16.msrb.mxu3 %v4463_v29  ;;  %v4412_v54 = vld [vmem:[#allocation9 + $0x350] sm:$0xf0]  ;;  %v4287_v58 = vor.u32 %v4874_v51, %v4284_v52  ;;  %v4806_v59 = vld [vmem:[#allocation9 + $0x24] sm:$0xf]  ;;  %v4897_v29 = vld [vmem:[#allocation9 + $0x2f4] sm:$0xf0] }
 0x248   : > { %2662 = vmatpush.bf16.msrb.mxu0 %v4063_v32  ;;  %v4012_v60 = vld [vmem:[#allocation9 + $0x30] sm:$0xf0]  ;;  %v4838_v61 = vld [vmem:[#allocation9 + $0x124] sm:$0xf]  ;;  %v4415_v63 = vor.u32 %v4906_v53, %v4412_v54  ;;  %v4115_v32 = vor.u32 %v4833_v22, %v4114_v21  ;;  %v4861_v38 = vld [vmem:[#allocation9 + $0x1d4] sm:$0xf0] }
 0x249   : > { %2675 = vmatpush.bf16.msrb.mxu1 %v4191_v62  ;;  %v4140_v0 = vld [vmem:[#allocation9 + $0x130] sm:$0xf0]  ;;  %v4870_v1 = vld [vmem:[#allocation9 + $0x224] sm:$0xf]  ;;  %v4015_v5 = vor.u32 %v4806_v59, %v4012_v60  ;;  %v4243_v62 = vor.u32 %v4865_v25, %v4242_v23  ;;  %v4354_v39 = vld [vmem:[#allocation9 + $0x2c8] sm:$0xf] }
 0x24a   : > { %2688 = vmatpush.bf16.msrb.mxu2 %v4319_v33  ;;  %v4268_v2 = vld [vmem:[#allocation9 + $0x230] sm:$0xf0]  ;;  %v4902_v3 = vld [vmem:[#allocation9 + $0x324] sm:$0xf]  ;;  %v4143_v10 = vor.u32 %v4838_v61, %v4140_v0  ;;  %v4371_v33 = vor.u32 %v4897_v29, %v4370_v26  ;;  %v4893_v40 = vld [vmem:[#allocation9 + $0x2d4] sm:$0xf0] }
 0x24b   : > { %2701 = vmatpush.bf16.msrb.mxu3 %v4447_v37  ;;  %v4396_v4 = vld [vmem:[#allocation9 + $0x330] sm:$0xf0]  ;;  %v4802_v8 = vld [vmem:[#allocation9 + $0x4] sm:$0xf]  ;;  %v4271_v11 = vor.u32 %v4870_v1, %v4268_v2  ;;  %v4499_v37 = vor.u32 %v4929_v31, %v4498_v7  ;;  %v4482_v41 = vld [vmem:[#allocation9 + $0x3c8] sm:$0xf] }
 0x24c   : > { %2663 = vmatpush.bf16.msrb.mxu0 %v4047_v43  ;;  %v3996_v9 = vld [vmem:[#allocation9 + $0x10] sm:$0xf0]  ;;  %v4834_v12 = vld [vmem:[#allocation9 + $0x104] sm:$0xf]  ;;  %v4399_v16 = vor.u32 %v4902_v3, %v4396_v4  ;;  %v4925_v42 = vld [vmem:[#allocation9 + $0x3d4] sm:$0xf0]  ;;  %v4099_v43 = vor.u32 %v4829_v35, %v4098_v34 }
 0x24d   : > { %2676 = vmatpush.bf16.msrb.mxu1 %v4175_v44  ;;  %v4124_v13 = vld [vmem:[#allocation9 + $0x110] sm:$0xf0]  ;;  %v4866_v15 = vld [vmem:[#allocation9 + $0x204] sm:$0xf]  ;;  %v3999_v24 = vor.u32 %v4802_v8, %v3996_v9  ;;  %v4227_v44 = vor.u32 %v4861_v38, %v4226_v36  ;;  %v4082_v46 = vld [vmem:[#allocation9 + $0xa8] sm:$0xf] }
 0x24e   : > { %2689 = vmatpush.bf16.msrb.mxu2 %v4303_v45  ;;  %v4252_v17 = vld [vmem:[#allocation9 + $0x210] sm:$0xf0]  ;;  %v4898_v18 = vld [vmem:[#allocation9 + $0x304] sm:$0xf]  ;;  %v4127_v6 = vor.u32 %v4834_v12, %v4124_v13  ;;  %v4355_v45 = vor.u32 %v4893_v40, %v4354_v39  ;;  %v4825_v47 = vld [vmem:[#allocation9 + $0xb4] sm:$0xf0] }
 0x24f   : > { %2702 = vmatpush.bf16.msrb.mxu3 %v4431_v49  ;;  %v4380_v20 = vld [vmem:[#allocation9 + $0x310] sm:$0xf0]  ;;  %v4255_v30 = vor.u32 %v4866_v15, %v4252_v17  ;;  %v4210_v48 = vld [vmem:[#allocation9 + $0x1a8] sm:$0xf]  ;;  %v4483_v49 = vor.u32 %v4925_v42, %v4482_v41  ;;  %v4857_v50 = vld [vmem:[#allocation9 + $0x1b4] sm:$0xf0] }
 0x250   : > { %2664 = vmatpush.bf16.msrb.mxu0 %v4031_v55  ;;  %v4383_v57 = vor.u32 %v4898_v18, %v4380_v20  ;;  %v4338_v51 = vld [vmem:[#allocation9 + $0x2a8] sm:$0xf]  ;;  %v4889_v52 = vld [vmem:[#allocation9 + $0x2b4] sm:$0xf0]  ;;  %v4083_v55 = vor.u32 %v4825_v47, %v4082_v46 }
 0x251   : > { %2677 = vmatpush.bf16.msrb.mxu1 %v4159_v56  ;;  %v4466_v53 = vld [vmem:[#allocation9 + $0x3a8] sm:$0xf]  ;;  %v4921_v54 = vld [vmem:[#allocation9 + $0x3b4] sm:$0xf0]  ;;  %v4211_v56 = vor.u32 %v4857_v50, %v4210_v48 }
 0x252   : > { %2690 = vmatpush.bf16.msrb.mxu2 %v4287_v58  ;;  %v4339_v58 = vor.u32 %v4889_v52, %v4338_v51  ;;  %v4066_v59 = vld [vmem:[#allocation9 + $0x88] sm:$0xf]  ;;  %v4821_v60 = vld [vmem:[#allocation9 + $0x94] sm:$0xf0] }
 0x253   : > { %2703 = vmatpush.bf16.msrb.mxu3 %v4415_v63  ;;  %v4194_v61 = vld [vmem:[#allocation9 + $0x188] sm:$0xf]  ;;  %v4467_v63 = vor.u32 %v4921_v54, %v4466_v53  ;;  %v4853_v0 = vld [vmem:[#allocation9 + $0x194] sm:$0xf0] }
 0x254   : > { %2665 = vmatpush.bf16.msrb.mxu0 %v4015_v5  ;;  %v4322_v1 = vld [vmem:[#allocation9 + $0x288] sm:$0xf]  ;;  %v4885_v2 = vld [vmem:[#allocation9 + $0x294] sm:$0xf0]  ;;  %v4067_v5 = vor.u32 %v4821_v60, %v4066_v59  ;;  %v4195_v8 = vor.u32 %v4853_v0, %v4194_v61  ;;  %v4244_v60 = vld [vmem:[#allocation9 + $0x1f8] sm:$0xf0] }
 0x255   : > { %2678 = vmatpush.bf16.msrb.mxu1 %v4143_v10  ;;  %v4450_v3 = vld [vmem:[#allocation9 + $0x388] sm:$0xf]  ;;  %v4917_v4 = vld [vmem:[#allocation9 + $0x394] sm:$0xf0]  ;;  %v4323_v9 = vor.u32 %v4885_v2, %v4322_v1  ;;  %v4895_v61 = vld [vmem:[#allocation9 + $0x2ec] sm:$0xf] }
 0x256   : > { %2691 = vmatpush.bf16.msrb.mxu2 %v4271_v11  ;;  %v4050_v10 = vld [vmem:[#allocation9 + $0x68] sm:$0xf]  ;;  %v4817_v11 = vld [vmem:[#allocation9 + $0x74] sm:$0xf0]  ;;  %v4451_v13 = vor.u32 %v4917_v4, %v4450_v3  ;;  %v4927_v2 = vld [vmem:[#allocation9 + $0x3ec] sm:$0xf] }
 0x257   : > { %2704 = vmatpush.bf16.msrb.mxu3 %v4399_v16  ;;  %v4178_v12 = vld [vmem:[#allocation9 + $0x168] sm:$0xf]  ;;  %v4849_v15 = vld [vmem:[#allocation9 + $0x174] sm:$0xf0]  ;;  %v4051_v21 = vor.u32 %v4817_v11, %v4050_v10  ;;  %v4500_v3 = vld [vmem:[#allocation9 + $0x3f8] sm:$0xf0] }
 0x258   : > { %2666 = vmatpush.bf16.msrb.mxu0 %v3999_v24  ;;  %v4306_v16 = vld [vmem:[#allocation9 + $0x268] sm:$0xf]  ;;  %v4881_v17 = vld [vmem:[#allocation9 + $0x274] sm:$0xf0]  ;;  %v4179_v22 = vor.u32 %v4849_v15, %v4178_v12  ;;  %v4827_v10 = vld [vmem:[#allocation9 + $0xcc] sm:$0xf] }
 0x259   : > { %2679 = vmatpush.bf16.msrb.mxu1 %v4127_v6  ;;  %v4434_v18 = vld [vmem:[#allocation9 + $0x368] sm:$0xf]  ;;  %v4913_v20 = vld [vmem:[#allocation9 + $0x374] sm:$0xf0]  ;;  %v4307_v23 = vor.u32 %v4881_v17, %v4306_v16  ;;  %v4100_v11 = vld [vmem:[#allocation9 + $0xd8] sm:$0xf0] }
 0x25a   : > { %2692 = vmatpush.bf16.msrb.mxu2 %v4255_v30  ;;  %v4034_v24 = vld [vmem:[#allocation9 + $0x48] sm:$0xf]  ;;  %v4813_v25 = vld [vmem:[#allocation9 + $0x54] sm:$0xf0]  ;;  %v4435_v29 = vor.u32 %v4913_v20, %v4434_v18  ;;  %v4859_v12 = vld [vmem:[#allocation9 + $0x1cc] sm:$0xf] }
 0x25b   : > { %2705 = vmatpush.bf16.msrb.mxu3 %v4383_v57  ;;  %2667 = vmatmul.bf16.vlgmr.msrb.gmra.mxu0 %v5744_v27  ;;  %v4162_v26 = vld [vmem:[#allocation9 + $0x148] sm:$0xf]  ;;  %v4845_v6 = vld [vmem:[#allocation9 + $0x154] sm:$0xf0]  ;;  %v4228_v15 = vld [vmem:[#allocation9 + $0x1d8] sm:$0xf0] }
 0x25c   : > { %2711 = vmatpush.bf16.msra.mxu0 %v4115_v32  ;;  %2680 = vmatmul.bf16.vlgmr.msrb.gmra.mxu1 %v5746_v28  ;;  %v4290_v30 = vld [vmem:[#allocation9 + $0x248] sm:$0xf]  ;;  %v4877_v7 = vld [vmem:[#allocation9 + $0x254] sm:$0xf0]  ;;  %v4035_v32 = vor.u32 %v4813_v25, %v4034_v24  ;;  %v4891_v16 = vld [vmem:[#allocation9 + $0x2cc] sm:$0xf] }
 0x25d   : > { %2724 = vmatpush.bf16.msra.mxu1 %v4243_v62  ;;  %2693 = vmatmul.bf16.vlgmr.msrb.gmra.mxu2 %v5739_v14  ;;  %v4418_v31 = vld [vmem:[#allocation9 + $0x348] sm:$0xf]  ;;  %v4909_v57 = vld [vmem:[#allocation9 + $0x354] sm:$0xf0]  ;;  %v4163_v62 = vor.u32 %v4845_v6, %v4162_v26  ;;  %v4356_v17 = vld [vmem:[#allocation9 + $0x2d8] sm:$0xf0] }
 0x25e   : > { %2737 = vmatpush.bf16.msra.mxu2 %v4371_v33  ;;  %2706 = vmatmul.bf16.vlgmr.msrb.gmra.mxu3 %v5741_v19  ;;  %v4291_v33 = vor.u32 %v4877_v7, %v4290_v30  ;;  %v4018_v34 = vld [vmem:[#allocation9 + $0x28] sm:$0xf]  ;;  %v4809_v35 = vld [vmem:[#allocation9 + $0x34] sm:$0xf0]  ;;  %v4923_v18 = vld [vmem:[#allocation9 + $0x3cc] sm:$0xf] }
 0x25f   : > { %2750 = vmatpush.bf16.msra.mxu3 %v4499_v37  ;;  %v4146_v36 = vld [vmem:[#allocation9 + $0x128] sm:$0xf]  ;;  %v4419_v37 = vor.u32 %v4909_v57, %v4418_v31  ;;  %v4841_v38 = vld [vmem:[#allocation9 + $0x134] sm:$0xf0]  ;;  %v4484_v20 = vld [vmem:[#allocation9 + $0x3d8] sm:$0xf0] }
 0x260   : > { %2712 = vmatpush.bf16.msra.mxu0 %v4099_v43  ;;  %v4274_v39 = vld [vmem:[#allocation9 + $0x228] sm:$0xf]  ;;  %v4873_v40 = vld [vmem:[#allocation9 + $0x234] sm:$0xf0]  ;;  %v4019_v43 = vor.u32 %v4809_v35, %v4018_v34  ;;  %v4147_v46 = vor.u32 %v4841_v38, %v4146_v36  ;;  %v4823_v24 = vld [vmem:[#allocation9 + $0xac] sm:$0xf] }
 0x261   : > { %2725 = vmatpush.bf16.msra.mxu1 %v4227_v44  ;;  %v4402_v41 = vld [vmem:[#allocation9 + $0x328] sm:$0xf]  ;;  %v4905_v42 = vld [vmem:[#allocation9 + $0x334] sm:$0xf0]  ;;  %v4275_v47 = vor.u32 %v4873_v40, %v4274_v39  ;;  %v4084_v25 = vld [vmem:[#allocation9 + $0xb8] sm:$0xf0] }
 0x262   : > { %2738 = vmatpush.bf16.msra.mxu2 %v4355_v45  ;;  %v4002_v44 = vld [vmem:[#allocation9 + $0x8] sm:$0xf]  ;;  %v4805_v45 = vld [vmem:[#allocation9 + $0x14] sm:$0xf0]  ;;  %v4403_v51 = vor.u32 %v4905_v42, %v4402_v41  ;;  %v4855_v26 = vld [vmem:[#allocation9 + $0x1ac] sm:$0xf] }
 0x263   : > { %2751 = vmatpush.bf16.msra.mxu3 %v4483_v49  ;;  %v4130_v48 = vld [vmem:[#allocation9 + $0x108] sm:$0xf]  ;;  %v4837_v49 = vld [vmem:[#allocation9 + $0x114] sm:$0xf0]  ;;  %v4003_v59 = vor.u32 %v4805_v45, %v4002_v44  ;;  %v4212_v6 = vld [vmem:[#allocation9 + $0x1b8] sm:$0xf0] }
 0x264   : > { %2713 = vmatpush.bf16.msra.mxu0 %v4083_v55  ;;  %v4258_v50 = vld [vmem:[#allocation9 + $0x208] sm:$0xf]  ;;  %v4869_v52 = vld [vmem:[#allocation9 + $0x214] sm:$0xf0]  ;;  %v4831_v55 = vld [vmem:[#allocation9 + $0xec] sm:$0xf]  ;;  %v4131_v0 = vor.u32 %v4837_v49, %v4130_v48 }
 0x265   : > { %2726 = vmatpush.bf16.msra.mxu1 %v4211_v56  ;;  %v4386_v53 = vld [vmem:[#allocation9 + $0x308] sm:$0xf]  ;;  %v4901_v54 = vld [vmem:[#allocation9 + $0x314] sm:$0xf0]  ;;  %v4116_v56 = vld [vmem:[#allocation9 + $0xf8] sm:$0xf0]  ;;  %v4259_v1 = vor.u32 %v4869_v52, %v4258_v50 }
 0x266   : > { %2739 = vmatpush.bf16.msra.mxu2 %v4339_v58  ;;  %v4863_v58 = vld [vmem:[#allocation9 + $0x1ec] sm:$0xf]  ;;  %v4387_v4 = vor.u32 %v4901_v54, %v4386_v53  ;;  %v4340_v7 = vld [vmem:[#allocation9 + $0x2b8] sm:$0xf0] }
 0x267   : > { %2752 = vmatpush.bf16.msra.mxu3 %v4467_v63  ;;  %v4372_v63 = vld [vmem:[#allocation9 + $0x2f8] sm:$0xf0]  ;;  %v4887_v30 = vld [vmem:[#allocation9 + $0x2ac] sm:$0xf] }
 0x268   : > { %2714 = vmatpush.bf16.msra.mxu0 %v4067_v5  ;;  %v4119_v5 = vor.u32 %v4831_v55, %v4116_v56  ;;  %v4919_v31 = vld [vmem:[#allocation9 + $0x3ac] sm:$0xf]  ;;  %v4468_v57 = vld [vmem:[#allocation9 + $0x3b8] sm:$0xf0] }
 0x269   : > { %2727 = vmatpush.bf16.msra.mxu1 %v4195_v8  ;;  %v4247_v8 = vor.u32 %v4863_v58, %v4244_v60  ;;  %v4819_v34 = vld [vmem:[#allocation9 + $0x8c] sm:$0xf]  ;;  %v4068_v35 = vld [vmem:[#allocation9 + $0x98] sm:$0xf0] }
 0x26a   : > { %2740 = vmatpush.bf16.msra.mxu2 %v4323_v9  ;;  %v4375_v9 = vor.u32 %v4895_v61, %v4372_v63  ;;  %v4851_v36 = vld [vmem:[#allocation9 + $0x18c] sm:$0xf]  ;;  %v4196_v38 = vld [vmem:[#allocation9 + $0x198] sm:$0xf0] }
 0x26b   : > { %2753 = vmatpush.bf16.msra.mxu3 %v4451_v13  ;;  %v4503_v13 = vor.u32 %v4927_v2, %v4500_v3  ;;  %v4883_v39 = vld [vmem:[#allocation9 + $0x28c] sm:$0xf]  ;;  %v4324_v40 = vld [vmem:[#allocation9 + $0x298] sm:$0xf0]  ;;  %v4199_v44 = vor.u32 %v4851_v36, %v4196_v38 }
 0x26c   : > { %2715 = vmatpush.bf16.msra.mxu0 %v4051_v21  ;;  %v4103_v21 = vor.u32 %v4827_v10, %v4100_v11  ;;  %v4915_v41 = vld [vmem:[#allocation9 + $0x38c] sm:$0xf]  ;;  %v4452_v42 = vld [vmem:[#allocation9 + $0x398] sm:$0xf0]  ;;  %v4327_v45 = vor.u32 %v4883_v39, %v4324_v40 }
 0x26d   : > { %2728 = vmatpush.bf16.msra.mxu1 %v4179_v22  ;;  %v4231_v22 = vor.u32 %v4859_v12, %v4228_v15  ;;  %v4847_v48 = vld [vmem:[#allocation9 + $0x16c] sm:$0xf]  ;;  %v4455_v49 = vor.u32 %v4915_v41, %v4452_v42  ;;  %v4180_v50 = vld [vmem:[#allocation9 + $0x178] sm:$0xf0]  ;;  %v1813_v42 = vld [vmem:[%s5801_s6] sm:$0xf] }
 0x26e   : > { %2741 = vmatpush.bf16.msra.mxu2 %v4307_v23  ;;  %v4359_v23 = vor.u32 %v4891_v16, %v4356_v17  ;;  %v4308_v52 = vld [vmem:[#allocation9 + $0x278] sm:$0xf0]  ;;  %v4911_v53 = vld [vmem:[#allocation9 + $0x36c] sm:$0xf]  ;;  %v4183_v56 = vor.u32 %v4847_v48, %v4180_v50 }
 0x26f   : > { %2754 = vmatpush.bf16.msra.mxu3 %v4435_v29  ;;  %v4487_v29 = vor.u32 %v4923_v18, %v4484_v20  ;;  %v4436_v54 = vld [vmem:[#allocation9 + $0x378] sm:$0xf0]  ;;  %v4843_v61 = vld [vmem:[#allocation9 + $0x14c] sm:$0xf] }
 0x270   : > { %2716 = vmatpush.bf16.msra.mxu0 %v4035_v32  ;;  %v4087_v32 = vor.u32 %v4823_v24, %v4084_v25  ;;  %v4036_v60 = vld [vmem:[#allocation9 + $0x58] sm:$0xf0]  ;;  %v4439_v63 = vor.u32 %v4911_v53, %v4436_v54  ;;  %v4907_v3 = vld [vmem:[#allocation9 + $0x34c] sm:$0xf] }
 0x271   : > { %2729 = vmatpush.bf16.msra.mxu1 %v4163_v62  ;;  %v4215_v62 = vor.u32 %v4855_v26, %v4212_v6  ;;  %v4292_v2 = vld [vmem:[#allocation9 + $0x258] sm:$0xf0]  ;;  %v4807_v10 = vld [vmem:[#allocation9 + $0x2c] sm:$0xf] }
 0x272   : > { %2742 = vmatpush.bf16.msra.mxu2 %v4291_v33  ;;  %v4343_v33 = vor.u32 %v4887_v30, %v4340_v7  ;;  %v4020_v11 = vld [vmem:[#allocation9 + $0x38] sm:$0xf0]  ;;  %v4839_v12 = vld [vmem:[#allocation9 + $0x12c] sm:$0xf] }
 0x273   : > { %2755 = vmatpush.bf16.msra.mxu3 %v4419_v37  ;;  %v4471_v37 = vor.u32 %v4919_v31, %v4468_v57  ;;  %v4148_v15 = vld [vmem:[#allocation9 + $0x138] sm:$0xf0]  ;;  %v4871_v16 = vld [vmem:[#allocation9 + $0x22c] sm:$0xf] }
 0x274   : > { %2717 = vmatpush.bf16.msra.mxu0 %v4019_v43  ;;  %v4071_v43 = vor.u32 %v4819_v34, %v4068_v35  ;;  %v4276_v17 = vld [vmem:[#allocation9 + $0x238] sm:$0xf0]  ;;  %v4903_v18 = vld [vmem:[#allocation9 + $0x32c] sm:$0xf] }
 0x275   : > { %2730 = vmatpush.bf16.msra.mxu1 %v4147_v46  ;;  %v4815_v46 = vld [vmem:[#allocation9 + $0x6c] sm:$0xf]  ;;  %v4404_v20 = vld [vmem:[#allocation9 + $0x338] sm:$0xf0] }
 0x276   : > { %2743 = vmatpush.bf16.msra.mxu2 %v4275_v47  ;;  %v4052_v47 = vld [vmem:[#allocation9 + $0x78] sm:$0xf0]  ;;  %v4803_v24 = vld [vmem:[#allocation9 + $0xc] sm:$0xf] }
 0x277   : > { %2756 = vmatpush.bf16.msra.mxu3 %v4403_v51  ;;  %v4879_v51 = vld [vmem:[#allocation9 + $0x26c] sm:$0xf]  ;;  %v4055_v55 = vor.u32 %v4815_v46, %v4052_v47  ;;  %v4004_v25 = vld [vmem:[#allocation9 + $0x18] sm:$0xf0] }
 0x278   : > { %2718 = vmatpush.bf16.msra.mxu0 %v4003_v59  ;;  %v4311_v58 = vor.u32 %v4879_v51, %v4308_v52  ;;  %v4811_v59 = vld [vmem:[#allocation9 + $0x4c] sm:$0xf]  ;;  %v4132_v6 = vld [vmem:[#allocation9 + $0x118] sm:$0xf0] }
 0x279   : > { %2731 = vmatpush.bf16.msra.mxu1 %v4131_v0  ;;  %v4164_v0 = vld [vmem:[#allocation9 + $0x158] sm:$0xf0]  ;;  %v4835_v26 = vld [vmem:[#allocation9 + $0x10c] sm:$0xf] }
 0x27a   : > { %2744 = vmatpush.bf16.msra.mxu2 %v4259_v1  ;;  %v4875_v1 = vld [vmem:[#allocation9 + $0x24c] sm:$0xf]  ;;  %v4260_v7 = vld [vmem:[#allocation9 + $0x218] sm:$0xf0] }
 0x27b   : > { %2757 = vmatpush.bf16.msra.mxu3 %v4387_v4  ;;  %2719 = vmatmul.bf16.vlgmr.msra.gmra.mxu0 %v5744_v27  ;;  %v4420_v4 = vld [vmem:[#allocation9 + $0x358] sm:$0xf0]  ;;  %v4867_v30 = vld [vmem:[#allocation9 + $0x20c] sm:$0xf] }
 0x27c   : > { %2763 = vmatpush.bf16.msrb.mxu0 %v4119_v5  ;;  %2732 = vmatmul.bf16.vlgmr.msra.gmra.mxu1 %v5746_v28  ;;  %v4039_v5 = vor.u32 %v4811_v59, %v4036_v60  ;;  %v4899_v31 = vld [vmem:[#allocation9 + $0x30c] sm:$0xf]  ;;  %v4388_v57 = vld [vmem:[#allocation9 + $0x318] sm:$0xf0] }
 0x27d   : > { %2776 = vmatpush.bf16.msrb.mxu1 %v4247_v8  ;;  %2745 = vmatmul.bf16.vlgmr.msra.gmra.mxu2 %v5739_v14  ;;  %v4167_v8 = vor.u32 %v4843_v61, %v4164_v0  ;;  %v4391_v34 = vor.u32 %v4899_v31, %v4388_v57 }
 0x27e   : > { %2789 = vmatpush.bf16.msrb.mxu2 %v4375_v9  ;;  %2758 = vmatmul.bf16.vlgmr.msra.gmra.mxu3 %v5741_v19  ;;  %v4295_v9 = vor.u32 %v4875_v1, %v4292_v2 }
 0x27f   : > { %2802 = vmatpush.bf16.msrb.mxu3 %v4503_v13  ;;  %v4423_v13 = vor.u32 %v4907_v3, %v4420_v4 }
 0x280   : > { %2764 = vmatpush.bf16.msrb.mxu0 %v4103_v21  ;;  %v4023_v21 = vor.u32 %v4807_v10, %v4020_v11  ;;  %v1948_v11 = vperm.slane %v1813_v42, 3 }
 0x281   : > { %2777 = vmatpush.bf16.msrb.mxu1 %v4231_v22  ;;  %v4151_v22 = vor.u32 %v4839_v12, %v4148_v15 }
 0x282   : > { %2790 = vmatpush.bf16.msrb.mxu2 %v4359_v23  ;;  %v4279_v23 = vor.u32 %v4871_v16, %v4276_v17 }
 0x283   : > { %2803 = vmatpush.bf16.msrb.mxu3 %v4487_v29  ;;  %v4407_v29 = vor.u32 %v4903_v18, %v4404_v20 }
 0x284   : > { %2765 = vmatpush.bf16.msrb.mxu0 %v4087_v32  ;;  %v4007_v32 = vor.u32 %v4803_v24, %v4004_v25 }
 0x285   : > { %2778 = vmatpush.bf16.msrb.mxu1 %v4215_v62  ;;  %v4135_v62 = vor.u32 %v4835_v26, %v4132_v6 }
 0x286   : > { %2791 = vmatpush.bf16.msrb.mxu2 %v4343_v33  ;;  %v4263_v33 = vor.u32 %v4867_v30, %v4260_v7 }
 0x287   : > { %2804 = vmatpush.bf16.msrb.mxu3 %v4471_v37 }
 0x288   : > { %2766 = vmatpush.bf16.msrb.mxu0 %v4071_v43 }
 0x289   : > { %2779 = vmatpush.bf16.msrb.mxu1 %v4199_v44 }
 0x28a   : > { %2792 = vmatpush.bf16.msrb.mxu2 %v4327_v45 }
 0x28b   : > { %2805 = vmatpush.bf16.msrb.mxu3 %v4455_v49 }
 0x28c   : > { %2767 = vmatpush.bf16.msrb.mxu0 %v4055_v55 }
 0x28d   : > { %2780 = vmatpush.bf16.msrb.mxu1 %v4183_v56 }
 0x28e   : > { %2793 = vmatpush.bf16.msrb.mxu2 %v4311_v58 }
 0x28f   : > { %2806 = vmatpush.bf16.msrb.mxu3 %v4439_v63 }
 0x290   : > { %2768 = vmatpush.bf16.msrb.mxu0 %v4039_v5 }
 0x291   : > { %2781 = vmatpush.bf16.msrb.mxu1 %v4167_v8 }
 0x292   : > { %2794 = vmatpush.bf16.msrb.mxu2 %v4295_v9  ;;  %v1947_v9 = vperm.slane %v1813_v42, 2 }
 0x293   : > { %2807 = vmatpush.bf16.msrb.mxu3 %v4423_v13 }
 0x294   : > { %2769 = vmatpush.bf16.msrb.mxu0 %v4023_v21 }
 0x295   : > { %2782 = vmatpush.bf16.msrb.mxu1 %v4151_v22 }
 0x296   : > { %2795 = vmatpush.bf16.msrb.mxu2 %v4279_v23 }
 0x297   : > { %2808 = vmatpush.bf16.msrb.mxu3 %v4407_v29 }
 0x298   : > { %2770 = vmatpush.bf16.msrb.mxu0 %v4007_v32 }
 0x299   : > { %2783 = vmatpush.bf16.msrb.mxu1 %v4135_v62 }
 0x29a   : > { %2796 = vmatpush.bf16.msrb.mxu2 %v4263_v33 }
 0x29b   : > { %2809 = vmatpush.bf16.msrb.mxu3 %v4391_v34  ;;  %2771 = vmatmul.bf16.vlgmr.msrb.gmra.mxu0 %v5744_v27  ;;  %v1945_v27 = vperm.slane %v1813_v42, 0 }
 0x29c   : > { %2784 = vmatmul.bf16.vlgmr.msrb.gmra.mxu1 %v5746_v28  ;;  %v1946_v28 = vperm.slane %v1813_v42, 1 }
 0x29d   : > { %2797 = vmatmul.bf16.vlgmr.msrb.gmra.mxu2 %v5739_v14 }
 0x29e   : > { %2810 = vmatmul.bf16.vlgmr.msrb.gmra.mxu3 %v5741_v19 }
 0x2bc   : > { %v2616_v35 = vpop.f32.mrf.mxu0 }
 0x2bd   : > { %v2629_v36 = vpop.f32.mrf.mxu1  ;;  %v2617_v44 = vadd.f32 %v2616_v35, %v1945_v27 }
 0x2bf   : > { %v2630_v45 = vadd.f32 %v2629_v36, %v2617_v44 }
 0x2c0   : > { %v2642_v37 = vpop.f32.mrf.mxu2 }
 0x2c1   : > { %v2655_v38 = vpop.f32.mrf.mxu3  ;;  %v2643_v47 = vadd.f32 %v2642_v37, %v2630_v45 }
 0x2c3   : > { %v2656_v50 = vadd.f32 %v2655_v38, %v2643_v47 }
 0x2c4   : > { %v2618_v39 = vpop.f32.mrf.mxu0 }
 0x2c5   : > { %v2631_v40 = vpop.f32.mrf.mxu1  ;;  %v2815_v56 = vmax.f32 %v2656_v50, 0.0 }
 0x2c8   : > { %v2644_v41 = vpop.f32.mrf.mxu2 }
 0x2c9   : > { %v2657_v43 = vpop.f32.mrf.mxu3 }
 0x2d8   : > { %v2668_v14 = vpop.f32.mrf.mxu0 }
 0x2d9   : > { %v2669_v46 = vadd.f32 %v2668_v14, %v1946_v28  ;;  %v2681_v19 = vpop.f32.mrf.mxu1 }
 0x2db   : > { %v2682_v48 = vadd.f32 %v2681_v19, %v2669_v46 }
 0x2e0   : > { %v2694_v49 = vpop.f32.mrf.mxu2  ;;  %v2670_v54 = vpop.f32.mrf.mxu0 }
 0x2e1   : > { %v2695_v51 = vadd.f32 %v2694_v49, %v2682_v48  ;;  %v2707_v52 = vpop.f32.mrf.mxu3  ;;  %v2683_v55 = vpop.f32.mrf.mxu1 }
 0x2e3   : > { %v2708_v53 = vadd.f32 %v2707_v52, %v2695_v51 }
 0x2e5   : > { %v2816_v58 = vmax.f32 %v2708_v53, 0.0 }
 0x2e7   : > { %v2819_v59 = vpack.c.bf16 %v2816_v58, %v2815_v56 }
 0x2e8   : > { %v2696_v60 = vpop.f32.mrf.mxu2 }
 0x2e9   : > { %2825 = vst [vmem:[%s2824_s12] sm:$0xff] %v2819_v59  ;;  %v2709_v61 = vpop.f32.mrf.mxu3 }
 0x2f8   : > { %v2720_v63 = vpop.f32.mrf.mxu0 }
 0x2f9   : > { %v2733_v0 = vpop.f32.mrf.mxu1  ;;  %v2721_v10 = vadd.f32 %v2720_v63, %v1947_v9 }
 0x2fb   : > { %v2734_v12 = vadd.f32 %v2733_v0, %v2721_v10 }
 0x300   : > { %v2746_v1 = vpop.f32.mrf.mxu2  ;;  %v2722_v3 = vpop.f32.mrf.mxu0 }
 0x301   : > { %v2759_v2 = vpop.f32.mrf.mxu3  ;;  %v2735_v4 = vpop.f32.mrf.mxu1  ;;  %v2747_v17 = vadd.f32 %v2746_v1, %v2734_v12 }
 0x303   : > { %v2760_v21 = vadd.f32 %v2759_v2, %v2747_v17 }
 0x305   : > { %v2817_v29 = vmax.f32 %v2760_v21, 0.0 }
 0x308   : > { %v2748_v5 = vpop.f32.mrf.mxu2 }
 0x309   : > { %v2761_v8 = vpop.f32.mrf.mxu3 }
 0x318   : > { %v2772_v13 = vpop.f32.mrf.mxu0 }
 0x319   : > { %v2773_v15 = vadd.f32 %v2772_v13, %v1948_v11  ;;  %v2785_v16 = vpop.f32.mrf.mxu1 }
 0x31b   : > { %v2786_v18 = vadd.f32 %v2785_v16, %v2773_v15 }
 0x320   : > { %v2798_v20 = vpop.f32.mrf.mxu2  ;;  %v2774_v24 = vpop.f32.mrf.mxu0 }
 0x321   : > { %v2799_v22 = vadd.f32 %v2798_v20, %v2786_v18  ;;  %v2811_v23 = vpop.f32.mrf.mxu3  ;;  %v2787_v25 = vpop.f32.mrf.mxu1 }
 0x323   : > { %v2812_v26 = vadd.f32 %v2811_v23, %v2799_v22 }
 0x325   : > { %v2818_v6 = vmax.f32 %v2812_v26, 0.0 }
 0x327   : > { %v2820_v30 = vpack.c.bf16 %v2818_v6, %v2817_v29 }
 0x328   : > { %v2800_v7 = vpop.f32.mrf.mxu2 }
 0x329   : > { %2826 = vst [vmem:[%s2824_s12 + $0x8] sm:$0xff] %v2820_v30  ;;  %v2813_v31 = vpop.f32.mrf.mxu3 }
 0x32a PF: > { %p4507_p1 = scmp.ne.s32.totalorder %s5358_s15, 1 }
 0x32c   : > { %2830 = sbr.rel (%p4507_p1) target bundleno = 992 (0x3e0), region = 88 }
 0x331   : > { %v4938_v57 = vld [vmem:[#allocation10 + $0x38] sm:$0xff]  ;;  %v4937_v34 = vld [vmem:[#allocation10 + $0x30] sm:$0xff]  ;;  %v4936_v38 = vld [vmem:[#allocation10 + $0x28] sm:$0xff] }
 0x332   : > { %v4946_v32 = vld [vmem:[#allocation10 + $0x78] sm:$0xff]  ;;  %3107 = vmatpush.bf16.msra.mxu0 %v4938_v57  ;;  %v4945_v35 = vld [vmem:[#allocation10 + $0x70] sm:$0xff]  ;;  %v4944_v39 = vld [vmem:[#allocation10 + $0x68] sm:$0xff] }
 0x333   : > { %v4954_v62 = vld [vmem:[#allocation10 + $0xb8] sm:$0xff]  ;;  %3120 = vmatpush.bf16.msra.mxu1 %v4946_v32  ;;  %v4953_v36 = vld [vmem:[#allocation10 + $0xb0] sm:$0xff]  ;;  %v4952_v40 = vld [vmem:[#allocation10 + $0xa8] sm:$0xff] }
 0x334   : > { %v4962_v33 = vld [vmem:[#allocation10 + $0xf8] sm:$0xff]  ;;  %3133 = vmatpush.bf16.msra.mxu2 %v4954_v62  ;;  %v4961_v37 = vld [vmem:[#allocation10 + $0xf0] sm:$0xff]  ;;  %v4960_v41 = vld [vmem:[#allocation10 + $0xe8] sm:$0xff] }
 0x335   : > { %3146 = vmatpush.bf16.msra.mxu3 %v4962_v33  ;;  %v4935_v42 = vld [vmem:[#allocation10 + $0x20] sm:$0xff]  ;;  %v4934_v28 = vld [vmem:[#allocation10 + $0x18] sm:$0xff]  ;;  %v4933_v19 = vld [vmem:[#allocation10 + $0x10] sm:$0xff] }
 0x336   : > { %3108 = vmatpush.bf16.msra.mxu0 %v4937_v34  ;;  %v4943_v43 = vld [vmem:[#allocation10 + $0x60] sm:$0xff]  ;;  %v4942_v45 = vld [vmem:[#allocation10 + $0x58] sm:$0xff]  ;;  %v4941_v47 = vld [vmem:[#allocation10 + $0x50] sm:$0xff] }
 0x337   : > { %3121 = vmatpush.bf16.msra.mxu1 %v4945_v35  ;;  %v4951_v27 = vld [vmem:[#allocation10 + $0xa0] sm:$0xff]  ;;  %v4950_v14 = vld [vmem:[#allocation10 + $0x98] sm:$0xff]  ;;  %v4949_v48 = vld [vmem:[#allocation10 + $0x90] sm:$0xff] }
 0x338   : > { %3134 = vmatpush.bf16.msra.mxu2 %v4953_v36  ;;  %v4959_v44 = vld [vmem:[#allocation10 + $0xe0] sm:$0xff]  ;;  %v4958_v46 = vld [vmem:[#allocation10 + $0xd8] sm:$0xff]  ;;  %v4957_v49 = vld [vmem:[#allocation10 + $0xd0] sm:$0xff] }
 0x339   : > { %3147 = vmatpush.bf16.msra.mxu3 %v4961_v37  ;;  %v4932_v50 = vld [vmem:[#allocation10 + $0x8] sm:$0xff]  ;;  %v2832_v52 = vld [vmem:[#allocation2] sm:$0xff] }
 0x33a   : > { %3109 = vmatpush.bf16.msra.mxu0 %v4936_v38  ;;  %v4940_v51 = vld [vmem:[#allocation10 + $0x48] sm:$0xff]  ;;  %v2903_v56 = vunpack.c.l.b16 %v2832_v52  ;;  %v2904_v58 = vunpack.c.h.b16 %v2832_v52  ;;  %v4931_v59 = vld [vmem:[#allocation10] sm:$0xff] }
 0x33b   : > { %3122 = vmatpush.bf16.msra.mxu1 %v4944_v39  ;;  %v4948_v53 = vld [vmem:[#allocation10 + $0x88] sm:$0xff]  ;;  %v4939_v60 = vld [vmem:[#allocation10 + $0x40] sm:$0xff] }
 0x33c   : > { %3135 = vmatpush.bf16.msra.mxu2 %v4952_v40  ;;  %v4956_v54 = vld [vmem:[#allocation10 + $0xc8] sm:$0xff]  ;;  %v4947_v0 = vld [vmem:[#allocation10 + $0x80] sm:$0xff]  ;;  %v2907_v2 = vpack.c.b16 %v2903_v56, %v2903_v56  ;;  %v2908_v3 = vpack.c.b16 %v2904_v58, %v2904_v58 }
 0x33d   : > { %3148 = vmatpush.bf16.msra.mxu3 %v4960_v41  ;;  %v2833_v55 = vld [vmem:[#allocation2 + $0x8] sm:$0xff]  ;;  %v4955_v1 = vld [vmem:[#allocation10 + $0xc0] sm:$0xff] }
 0x33e   : > { %3110 = vmatpush.bf16.msra.mxu0 %v4935_v42  ;;  %v2905_v61 = vunpack.c.l.b16 %v2833_v55  ;;  %v2906_v63 = vunpack.c.h.b16 %v2833_v55  ;;  %v5040_v8 = vld [vmem:[%s5803_s8] ss:$0 sm:$0xff] }
 0x33f   : > { %3123 = vmatpush.bf16.msra.mxu1 %v4943_v43 }
 0x340   : > { %3136 = vmatpush.bf16.msra.mxu2 %v4951_v27  ;;  %v2909_v4 = vpack.c.b16 %v2905_v61, %v2905_v61  ;;  %v2910_v5 = vpack.c.b16 %v2906_v63, %v2906_v63 }
 0x341   : > { %3149 = vmatpush.bf16.msra.mxu3 %v4959_v44 }
 0x342   : > { %3111 = vmatpush.bf16.msra.mxu0 %v4934_v28 }
 0x343   : > { %3124 = vmatpush.bf16.msra.mxu1 %v4942_v45 }
 0x344   : > { %3137 = vmatpush.bf16.msra.mxu2 %v4950_v14 }
 0x345   : > { %3150 = vmatpush.bf16.msra.mxu3 %v4958_v46 }
 0x346   : > { %3112 = vmatpush.bf16.msra.mxu0 %v4933_v19 }
 0x347   : > { %3125 = vmatpush.bf16.msra.mxu1 %v4941_v47 }
 0x348   : > { %3138 = vmatpush.bf16.msra.mxu2 %v4949_v48 }
 0x349   : > { %3151 = vmatpush.bf16.msra.mxu3 %v4957_v49 }
 0x34a   : > { %3113 = vmatpush.bf16.msra.mxu0 %v4932_v50 }
 0x34b   : > { %3126 = vmatpush.bf16.msra.mxu1 %v4940_v51 }
 0x34c   : > { %3139 = vmatpush.bf16.msra.mxu2 %v4948_v53 }
 0x34d   : > { %3152 = vmatpush.bf16.msra.mxu3 %v4956_v54 }
 0x34e   : > { %3114 = vmatpush.bf16.msra.mxu0 %v4931_v59 }
 0x34f   : > { %3127 = vmatpush.bf16.msra.mxu1 %v4939_v60 }
 0x350   : > { %3140 = vmatpush.bf16.msra.mxu2 %v4947_v0 }
 0x351   : > { %3153 = vmatpush.bf16.msra.mxu3 %v4955_v1  ;;  %3115 = vmatmul.bf16.vlgmr.msra.gmra.mxu0 %v2907_v2 }
 0x352   : > { %3128 = vmatmul.bf16.vlgmr.msra.gmra.mxu1 %v2908_v3 }
 0x353   : > { %3141 = vmatmul.bf16.vlgmr.msra.gmra.mxu2 %v2909_v4 }
 0x354   : > { %3154 = vmatmul.bf16.vlgmr.msra.gmra.mxu3 %v2910_v5 }
 0x3ce   : > { %v3116_v9 = vpop.f32.mrf.mxu0 }
 0x3cf   : > { %v3129_v10 = vpop.f32.mrf.mxu1  ;;  %v3117_v11 = vadd.f32 %v5040_v8, %v3116_v9 }
 0x3d1   : > { %v3130_v12 = vadd.f32 %v3129_v10, %v3117_v11 }
 0x3d6   : > { %v3142_v13 = vpop.f32.mrf.mxu2  ;;  %v3118_v17 = vpop.f32.mrf.mxu0 }
 0x3d7   : > { %v3155_v15 = vpop.f32.mrf.mxu3  ;;  %v3143_v16 = vadd.f32 %v3142_v13, %v3130_v12  ;;  %v3131_v18 = vpop.f32.mrf.mxu1 }
 0x3d9   : > { %v3156_v20 = vadd.f32 %v3155_v15, %v3143_v16 }
 0x3db   : > { %v3159_v21 = vmax.f32 %v3156_v20, 0.0 }
 0x3dd   : > { %3160 = vst [vmem:[#allocation12] sm:$0xff] %v3159_v21 }
 0x3de   : > { %v3144_v22 = vpop.f32.mrf.mxu2 }
 0x3df   : > { %v3157_v23 = vpop.f32.mrf.mxu3 }
 0x3e0 PF: > { %p4998_p2 = scmp.eq.s32.totalorder %s5358_s15, 1  ;;  %s5248_s3 = smov [#allocation12]  }
 0x3e1   : > { %s3167_s17 = sshll.u32 %s5248_s3, 4  ;;  %s3169_s21 = sshll.u32 %s5804_s9, 4  ;;  %s3168_s17 = int_to_ptr.vmem [resolvable:$true] %s3167_s17  ;;  %s3170_s21 = int_to_ptr.hbm [resolvable:$true] %s3169_s21 }
 0x3e2   : > { %4976 = dma.vmem_to_hbm [thread:$0]  (%p4998_p2), %s3168_s17, 128, %s3170_s21, [#allocation6]  }
 0x3e3   : > { %5222 = dma.done.wait (%p4998_p2), [#allocation6], 128  }
 0x3e4   : > { %5224 = vsyncadd (%p4998_p2), [#allocation6], 4294967168 }
 0x3e5 PF: > { %p22_p3 = scmp.ge.s32.totalorder %s5320_s13, 4   ;;  %s5814_s30 = smov %s5231_s10 }
 0x3e6   : > { %s5815_s10 = smov %s5235_s11  ;;  %s5816_s11 = smov %s5337_s19 }
 0x3e7   : > { %s5817_s12 = smov %s5320_s13  ;;  %24 = sbr.rel (!%p22_p3) target bundleno = 9 (0x9), region = 137 }
 0x3ec   :  { %3183 = vsyncpa [#allocation5], 1 }
 0x3ed   :  { %3185 = vsyncpa [#allocation5 + $0x1], 1 }
 0x3ee   :  { %3186 = vsyncpa [#allocation8], 1 }
 0x3ef   :  { %3188 = vsyncpa [#allocation8 + $0x1], 1 }
 0x3f0   :  { %3189 = vsyncpa [#allocation11], 1 }
 0x3f1   :  { %3190 = vsyncpa [#allocation6], 1 }
 0x3f2   :  { %3192 = vsyncpa [#allocation6 + $0x1], 1 }

</bundles_post_ra>
